<compile_context>
chip_gen: v7x
topology: tpu7x:2x2x1
jax: 0.10.0
libtpu: 0.0.40
codegen_flags: <defaults>
</compile_context>

<pallas_src>
import functools
import math

import jax
import jax.numpy as jnp
import numpy as np
from jax import lax
from jax.experimental import pallas as pl
from jax.experimental.pallas import tpu as pltpu


def _relu6(v):
    return jnp.clip(v, 0.0, 6.0)


def _round_up(n, m):
    return (n + m - 1) // m * m


# --------------------------- fused block kernel ----------------------------
def _inverted_block_kernel(*refs, H, W, K, stride, expand, residual, LP):
    """bt images per step: expand(1x1) -> dw(3x3) -> project(1x1) [+ residual]."""
    it = iter(refs)
    x_ref = next(it)                          # (bt, H, W, Cin) f32, NHWC
    xr_ref = next(it) if residual else None   # (bt, Cin, H*W)  f32, NCHW-flat
    if expand:
        w1_ref = next(it)                     # (Cin, hidden)   bf16 (BN folded)
        b1_ref = next(it)                     # (1, hidden)     f32
    wd_ref = next(it)                         # (K*K, hidden)   f32  (BN folded)
    bd_ref = next(it)                         # (1, hidden)     f32
    w2_ref = next(it)                         # (Cout, hidden)  bf16 (BN folded)
    b2_ref = next(it)                         # (Cout, 1)       f32
    o_ref = next(it)                          # (bt, Cout, Ho*Wo) f32
    hpad_ref = next(it)                       # (bt, Hp, Wpad, hidden)
    if stride == 2:
        hdeE_ref = next(it)                   # (bt, Hp, WE, hidden) even cols
        hdeO_ref = next(it)                   # (bt, Hp, WE, hidden) odd cols

    p = (K - 1) // 2
    Ho = (H + 2 * p - K) // stride + 1
    Wo = (W + 2 * p - K) // stride + 1
    bt = x_ref.shape[0]
    Cin = x_ref.shape[-1]
    hidden = wd_ref.shape[-1]
    M = Ho * Wo
    Hp = H + 2 * p
    Wp = W + 2 * p
    hdt = hpad_ref.dtype

    # ---- zero only the halo strips (interior is fully overwritten below) ----
    hpad_ref[:, :, pl.ds(LP - p, p), :] = jnp.zeros((bt, Hp, p, hidden), hdt)
    hpad_ref[:, :, pl.ds(LP + W, p), :] = jnp.zeros((bt, Hp, p, hidden), hdt)
    hpad_ref[:, pl.ds(0, p), pl.ds(LP - p, Wp), :] = jnp.zeros((bt, p, Wp, hidden), hdt)
    hpad_ref[:, pl.ds(p + H, p), pl.ds(LP - p, Wp), :] = jnp.zeros((bt, p, Wp, hidden), hdt)

    # ---- 1x1 expand conv (BN folded) + ReLU6 on the MXU ----
    x = x_ref[...]
    if expand:
        x2 = x.reshape(bt * H * W, Cin)
        h = jnp.dot(x2.astype(w1_ref.dtype), w1_ref[...],
                    preferred_element_type=jnp.float32)
        h = _relu6(h + b1_ref[...])
        h = h.reshape(bt, H, W, hidden)
    else:
        h = x                                  # expand_ratio == 1: hidden == Cin

    # ---- hidden activation stays VMEM-resident; interior store is aligned ----
    hpad_ref[:, pl.ds(p, H), pl.ds(LP, W), :] = h.astype(hdt)

    # ---- 3x3 depthwise conv (BN folded) + ReLU6 on the VPU ----
    if stride == 2:
        # De-interleave W once (even / odd padded columns) so the 9 tap reads
        # below are contiguous instead of sublane-strided.
        nE = Wo + 1
        ev = hpad_ref[:, :, pl.ds(LP - p, nE, 2), :]
        od = hpad_ref[:, :, pl.ds(LP - p + 1, Wo, 2), :]
        hdeE_ref[:, :, pl.ds(0, nE), :] = ev
        hdeO_ref[:, :, pl.ds(0, Wo), :] = od

    acc = jnp.zeros((bt, Ho, Wo, hidden), jnp.float32)
    for t in range(K * K):
        kh, kw = divmod(t, K)
        if stride == 1:
            xt = hpad_ref[:, pl.ds(kh, Ho), pl.ds(LP - p + kw, Wo), :]
        else:
            src = hdeE_ref if kw % 2 == 0 else hdeO_ref
            xt = src[:, pl.ds(kh, Ho, 2), pl.ds(kw // 2, Wo), :]
        acc = acc + xt.astype(jnp.float32) * wd_ref[t, :][None, None, None, :]
    hdw = _relu6(acc + bd_ref[0, :][None, None, None, :])

    # ---- 1x1 project conv (BN folded) + ReLU6, lane-dense (Cout, M) output ---
    w2 = w2_ref[...]
    hdw2 = hdw.reshape(bt * M, hidden).astype(w2.dtype)
    # (Cout, hidden) x (bt*M, hidden)^T -> (Cout, bt*M): spatial on lanes.
    yt = lax.dot_general(w2, hdw2, (((1,), (1,)), ((), ())),
                         preferred_element_type=jnp.float32)
    yt = _relu6(yt + b2_ref[...])
    for b in range(bt):
        yb = yt[:, b * M:(b + 1) * M]
        if residual:                           # stride == 1 and Cin == Cout
            yb = yb + xr_ref[b]
        o_ref[b] = yb


# ------------------------------- wrapper -----------------------------------
def inverted_block_v2(x_nchw, params, *, stride, batch_tile=None,
                      hidden_dtype=jnp.float32):
    """InvertedBlockV2.forward — NCHW in / NCHW out (PyTorch layout).

    hidden_dtype: dtype of the VMEM-resident padded hidden activation.  Use
    jnp.bfloat16 on v6e/v7x to halve the scratch footprint / vld bytes (keep
    f32 on v5e, which has no bf16 VPU path).
    """
    K = 3
    assert stride in (1, 2)
    B, Cin, H, W = x_nchw.shape
    hidden = params["wd"].shape[1]
    Cout = params["w2t"].shape[0]
    expand = "w1" in params
    residual = (stride == 1 and Cin == Cout)
    p = (K - 1) // 2
    Ho = (H + 2 * p - K) // stride + 1
    Wo = (W + 2 * p - K) // stride + 1
    M = Ho * Wo

    # batch-into-M: fold several images into each grid step, but keep >= 2
    # steps so the pipeline has depth and megacore parts get work on both TCs.
    if batch_tile is None:
        divs = [d for d in range(1, B + 1) if B % d == 0 and d <= 8]
        cands = [d for d in divs if B // d >= 2]
        batch_tile = max(cands) if cands else max(divs)
    bt = batch_tile
    assert B % bt == 0
    grid = (B // bt,)

    x_nhwc = jnp.transpose(x_nchw, (0, 2, 3, 1)).astype(jnp.float32)

    # Sublane-aligned interior start for the padded hidden scratch.
    LP = 16 if jnp.dtype(hidden_dtype).itemsize < 4 else 8
    Hp = H + 2 * p
    Wpad = _round_up(LP + W + p, 8)
    WE = _round_up(Wo + 1, 8)

    args = [x_nhwc]
    in_specs = [pl.BlockSpec((bt, H, W, Cin), lambda b: (b, 0, 0, 0))]
    if residual:
        args.append(x_nchw.reshape(B, Cin, H * W).astype(jnp.float32))
        in_specs.append(pl.BlockSpec((bt, Cin, H * W), lambda b: (b, 0, 0)))

    def const_spec(a):
        return pl.BlockSpec(a.shape, lambda b: (0,) * a.ndim)

    if expand:
        args += [params["w1"], params["b1"]]
        in_specs += [const_spec(params["w1"]), const_spec(params["b1"])]
    args += [params["wd"], params["bd"], params["w2t"], params["b2"]]
    in_specs += [const_spec(params["wd"]), const_spec(params["bd"]),
                 const_spec(params["w2t"]), const_spec(params["b2"])]

    scratch = [pltpu.VMEM((bt, Hp, Wpad, hidden), hidden_dtype)]
    if stride == 2:
        scratch += [pltpu.VMEM((bt, Hp, WE, hidden), hidden_dtype),
                    pltpu.VMEM((bt, Hp, WE, hidden), hidden_dtype)]

    # VMEM budget derived from the actual per-step buffers (double-buffered
    # ins/outs) plus headroom for the materialized h / acc / hdw values.
    def nbytes(shape, dtype):
        return int(np.prod(shape)) * jnp.dtype(dtype).itemsize

    est = 2 * sum(nbytes(a.shape, a.dtype) for a in args)
    est += 2 * nbytes((bt, Cout, M), jnp.float32)
    est += nbytes((bt, Hp, Wpad, hidden), hidden_dtype)
    if stride == 2:
        est += 2 * nbytes((bt, Hp, WE, hidden), hidden_dtype)
    est += 4 * nbytes((bt, H, W, hidden), jnp.float32) + (1 << 21)
    vmem_limit = int(min(96 * 2**20, max(16 * 2**20, 2 * est)))

    kern = functools.partial(_inverted_block_kernel, H=H, W=W, K=K,
                             stride=stride, expand=expand, residual=residual,
                             LP=LP)

    y = pl.pallas_call(
        kern,
        grid=grid,
        out_shape=jax.ShapeDtypeStruct((B, Cout, M), jnp.float32),
        in_specs=in_specs,
        out_specs=pl.BlockSpec((bt, Cout, M), lambda b: (b, 0, 0)),
        scratch_shapes=scratch,
        compiler_params=pltpu.CompilerParams(
            dimension_semantics=("parallel",),
            vmem_limit_bytes=vmem_limit),
    )(*args)
    return y.reshape(B, Cout, Ho, Wo)           # already NCHW: reshape only


# ---------------------------- parameter init --------------------------------
def init_inverted_block_params(key, ch_in, ch_out, expand_ratio, eps=1e-5):
    """Folded-BN parameters (scale folded into conv weights; bias-only epilogue)."""
    K = 3
    hidden = ch_in * expand_ratio
    k1, k2, k3 = jax.random.split(key, 3)
    scale = 1.0 / math.sqrt(1.0 + eps)          # inference-mode BN fold

    def conv_w(k, shape, fan_in):
        return math.sqrt(2.0 / fan_in) * jax.random.normal(k, shape, jnp.float32)

    params = {}
    if expand_ratio != 1:
        params["w1"] = (conv_w(k1, (ch_in, hidden), ch_in) * scale).astype(jnp.bfloat16)
        params["b1"] = jnp.zeros((1, hidden), jnp.float32)
    params["wd"] = conv_w(k2, (K * K, hidden), K * K) * scale
    params["bd"] = jnp.zeros((1, hidden), jnp.float32)
    # Projection weight stored transposed (Cout, hidden) for the lane-dense matmul.
    params["w2t"] = (conv_w(k3, (hidden, ch_out), hidden).T * scale).astype(jnp.bfloat16)
    params["b2"] = jnp.zeros((ch_out, 1), jnp.float32)
    return params


# ----------------------- pure-JAX (XLA) reference ---------------------------
def inverted_block_v2_reference(x_nchw, params, *, stride):
    K = 3
    x = jnp.transpose(x_nchw, (0, 2, 3, 1)).astype(jnp.float32)
    B, H, W, Cin = x.shape
    p = (K - 1) // 2
    hidden = params["wd"].shape[1]
    Cout = params["w2t"].shape[0]
    Ho = (H + 2 * p - K) // stride + 1
    Wo = (W + 2 * p - K) // stride + 1

    h = x
    if "w1" in params:
        h = jnp.einsum("bhwc,cd->bhwd", h.astype(params["w1"].dtype), params["w1"],
                       preferred_element_type=jnp.float32)
        h = _relu6(h + params["b1"][0])
    hp = jnp.pad(h, ((0, 0), (p, p), (p, p), (0, 0)))
    wd = params["wd"].reshape(K, K, hidden)
    acc = jnp.zeros((B, Ho, Wo, hidden), jnp.float32)
    for kh in range(K):
        for kw in range(K):
            xt = hp[:, kh:kh + stride * (Ho - 1) + 1:stride,
                    kw:kw + stride * (Wo - 1) + 1:stride, :]
            acc = acc + xt * wd[kh, kw]
    hdw = _relu6(acc + params["bd"][0])
    y = jnp.einsum("bhwc,oc->bhwo", hdw.astype(params["w2t"].dtype), params["w2t"],
                   preferred_element_type=jnp.float32)
    y = _relu6(y + params["b2"][:, 0])
    if stride == 1 and Cout == Cin:
        y = y + x
    return jnp.transpose(y, (0, 3, 1, 2))


# --------------------------------- main -------------------------------------
if __name__ == "__main__":
    key = jax.random.PRNGKey(0)
    kx, kp1, kp2, kp3 = jax.random.split(key, 4)
    x = jax.random.normal(kx, (2, 4, 16, 16), jnp.float32)   # NCHW, PyTorch-style

    configs = [
        dict(ch_in=4, ch_out=4, expand_ratio=6, stride=1),   # expand + residual
        dict(ch_in=4, ch_out=8, expand_ratio=6, stride=2),   # expand + stride 2
        dict(ch_in=4, ch_out=4, expand_ratio=1, stride=1),   # no expand + residual
    ]
    for cfg, pk in zip(configs, (kp1, kp2, kp3)):
        params = init_inverted_block_params(pk, cfg["ch_in"], cfg["ch_out"],
                                            cfg["expand_ratio"])
        fwd = jax.jit(functools.partial(inverted_block_v2, stride=cfg["stride"]))
        out = fwd(x, params)
        jax.block_until_ready(out)
        Ho = (x.shape[2] + 2 - 3) // cfg["stride"] + 1
        assert out.shape == (x.shape[0], cfg["ch_out"], Ho, Ho), out.shape
        ref = inverted_block_v2_reference(x, params, stride=cfg["stride"])
        np.testing.assert_allclose(np.asarray(out), np.asarray(ref),
                                   rtol=1e-2, atol=1e-2)
    print("KERNEL_OK")
</pallas_src>

<mosaic_0001>
module attributes {stable_mosaic.version = 11 : i64} {
  func.func @_inverted_block_kernel(%arg0: i32, %arg1: memref<1x16x16x4xf32, #tpu.memory_space<vmem>>, %arg2: memref<1x4x256xf32, #tpu.memory_space<vmem>>, %arg3: memref<4x24xbf16, #tpu.memory_space<vmem>>, %arg4: memref<1x24xf32, #tpu.memory_space<vmem>>, %arg5: memref<9x24xf32, #tpu.memory_space<vmem>>, %arg6: memref<1x24xf32, #tpu.memory_space<vmem>>, %arg7: memref<4x24xbf16, #tpu.memory_space<vmem>>, %arg8: memref<4x1xf32, #tpu.memory_space<vmem>>, %arg9: memref<1x4x256xf32, #tpu.memory_space<vmem>>, %arg10: memref<1x18x32x24xf32, #tpu.memory_space<vmem>>) attributes {dimension_semantics = [#tpu.dimension_semantics<parallel>], iteration_bounds = array<i64: 2>, scalar_prefetch = 0 : i64, scratch_operands = 1 : i64, tpu.core_type = #tpu.core_type<tc>, window_params = [{transform_indices = @transform_0, window_bounds = array<i64: 1, 16, 16, 4>}, {transform_indices = @transform_1, window_bounds = array<i64: 1, 4, 256>}, {pipeline_mode = #tpu.pipeline_mode<synchronous>, transform_indices = @transform_2, window_bounds = array<i64: 4, 24>}, {pipeline_mode = #tpu.pipeline_mode<synchronous>, transform_indices = @transform_3, window_bounds = array<i64: 1, 24>}, {pipeline_mode = #tpu.pipeline_mode<synchronous>, transform_indices = @transform_4, window_bounds = array<i64: 9, 24>}, {pipeline_mode = #tpu.pipeline_mode<synchronous>, transform_indices = @transform_5, window_bounds = array<i64: 1, 24>}, {pipeline_mode = #tpu.pipeline_mode<synchronous>, transform_indices = @transform_6, window_bounds = array<i64: 4, 24>}, {pipeline_mode = #tpu.pipeline_mode<synchronous>, transform_indices = @transform_7, window_bounds = array<i64: 4, 1>}, {transform_indices = @transform_8, window_bounds = array<i64: 1, 4, 256>}]} {
    %cst = arith.constant 0.000000e+00 : f32
    %0 = vector.broadcast %cst : f32 to vector<1x18x1x24xf32>
    %c0 = arith.constant 0 : index
    %c0_0 = arith.constant 0 : index
    %c7 = arith.constant 7 : index
    %c0_1 = arith.constant 0 : index
    %1 = vector.load %arg10[%c0, %c0_0, %c7, %c0_1] : memref<1x18x32x24xf32, #tpu.memory_space<vmem>>, vector<1x18x1x24xf32>
    tpu.vector_store %arg10[%c0, %c0_0, %c7, %c0_1], %0 {strides = array<i32>} : memref<1x18x32x24xf32, #tpu.memory_space<vmem>>, vector<1x18x1x24xf32>,
    %cst_2 = arith.constant 0.000000e+00 : f32
    %2 = vector.broadcast %cst_2 : f32 to vector<1x18x1x24xf32>
    %c0_3 = arith.constant 0 : index
    %c0_4 = arith.constant 0 : index
    %c24 = arith.constant 24 : index
    %c0_5 = arith.constant 0 : index
    %3 = vector.load %arg10[%c0_3, %c0_4, %c24, %c0_5] : memref<1x18x32x24xf32, #tpu.memory_space<vmem>>, vector<1x18x1x24xf32>
    tpu.vector_store %arg10[%c0_3, %c0_4, %c24, %c0_5], %2 {strides = array<i32>} : memref<1x18x32x24xf32, #tpu.memory_space<vmem>>, vector<1x18x1x24xf32>,
    %cst_6 = arith.constant 0.000000e+00 : f32
    %4 = vector.broadcast %cst_6 : f32 to vector<1x1x18x24xf32>
    %c0_7 = arith.constant 0 : index
    %c0_8 = arith.constant 0 : index
    %c7_9 = arith.constant 7 : index
    %c0_10 = arith.constant 0 : index
    %5 = vector.load %arg10[%c0_7, %c0_8, %c7_9, %c0_10] : memref<1x18x32x24xf32, #tpu.memory_space<vmem>>, vector<1x1x18x24xf32>
    tpu.vector_store %arg10[%c0_7, %c0_8, %c7_9, %c0_10], %4 {strides = array<i32>} : memref<1x18x32x24xf32, #tpu.memory_space<vmem>>, vector<1x1x18x24xf32>,
    %cst_11 = arith.constant 0.000000e+00 : f32
    %6 = vector.broadcast %cst_11 : f32 to vector<1x1x18x24xf32>
    %c0_12 = arith.constant 0 : index
    %c17 = arith.constant 17 : index
    %c7_13 = arith.constant 7 : index
    %c0_14 = arith.constant 0 : index
    %7 = vector.load %arg10[%c0_12, %c17, %c7_13, %c0_14] : memref<1x18x32x24xf32, #tpu.memory_space<vmem>>, vector<1x1x18x24xf32>
    tpu.vector_store %arg10[%c0_12, %c17, %c7_13, %c0_14], %6 {strides = array<i32>} : memref<1x18x32x24xf32, #tpu.memory_space<vmem>>, vector<1x1x18x24xf32>,
    %c0_15 = arith.constant 0 : index
    %c0_16 = arith.constant 0 : index
    %c0_17 = arith.constant 0 : index
    %c0_18 = arith.constant 0 : index
    %8 = vector.load %arg1[%c0_15, %c0_16, %c0_17, %c0_18] : memref<1x16x16x4xf32, #tpu.memory_space<vmem>>, vector<1x16x16x4xf32>
    %9 = vector.shape_cast %8 : vector<1x16x16x4xf32> to vector<256x4xf32>
    %10 = arith.truncf %9 : vector<256x4xf32> to vector<256x4xbf16>
    %c0_19 = arith.constant 0 : index
    %c0_20 = arith.constant 0 : index
    %11 = vector.load %arg3[%c0_19, %c0_20] : memref<4x24xbf16, #tpu.memory_space<vmem>>, vector<4x24xbf16>
    %cst_21 = arith.constant dense<0.000000e+00> : vector<256x24xf32>
    %12 = tpu.matmul %10, %11, %cst_21 {dimension_numbers = #tpu.dot_dimension_numbers<[1], [0], [0], [1], [0, 0, 1, 1], [], []>} : vector<256x4xbf16>, vector<4x24xbf16>, vector<256x24xf32> -> vector<256x24xf32>
    %c0_22 = arith.constant 0 : index
    %c0_23 = arith.constant 0 : index
    %13 = vector.load %arg4[%c0_22, %c0_23] : memref<1x24xf32, #tpu.memory_space<vmem>>, vector<1x24xf32>
    %14 = vector.broadcast %13 : vector<1x24xf32> to vector<256x24xf32>
    %15 = arith.addf %12, %14 : vector<256x24xf32>
    %cst_24 = arith.constant 0.000000e+00 : f32
    %cst_25 = arith.constant 6.000000e+00 : f32
    %16 = vector.broadcast %cst_24 : f32 to vector<256x24xf32>
    %17 = arith.maximumf %16, %15 : vector<256x24xf32>
    %18 = vector.broadcast %cst_25 : f32 to vector<256x24xf32>
    %19 = arith.minimumf %18, %17 : vector<256x24xf32>
    %20 = vector.shape_cast %19 : vector<256x24xf32> to vector<1x16x16x24xf32>
    %c0_26 = arith.constant 0 : index
    %c1 = arith.constant 1 : index
    %c8 = arith.constant 8 : index
    %c0_27 = arith.constant 0 : index
    %21 = vector.load %arg10[%c0_26, %c1, %c8, %c0_27] : memref<1x18x32x24xf32, #tpu.memory_space<vmem>>, vector<1x16x16x24xf32>
    tpu.vector_store %arg10[%c0_26, %c1, %c8, %c0_27], %20 {strides = array<i32>} : memref<1x18x32x24xf32, #tpu.memory_space<vmem>>, vector<1x16x16x24xf32>,
    %cst_28 = arith.constant 0.000000e+00 : f32
    %22 = vector.broadcast %cst_28 : f32 to vector<1x16x16x24xf32>
    %c0_29 = arith.constant 0 : index
    %c0_30 = arith.constant 0 : index
    %c7_31 = arith.constant 7 : index
    %c0_32 = arith.constant 0 : index
    %23 = vector.load %arg10[%c0_29, %c0_30, %c7_31, %c0_32] : memref<1x18x32x24xf32, #tpu.memory_space<vmem>>, vector<1x16x16x24xf32>
    %c0_33 = arith.constant 0 : index
    %c0_34 = arith.constant 0 : index
    %24 = vector.load %arg5[%c0_33, %c0_34] : memref<9x24xf32, #tpu.memory_space<vmem>>, vector<1x24xf32>
    %25 = vector.shape_cast %24 : vector<1x24xf32> to vector<24xf32>
    %26 = vector.shape_cast %25 : vector<24xf32> to vector<1x1x1x24xf32>
    %27 = vector.broadcast %26 : vector<1x1x1x24xf32> to vector<1x16x16x24xf32>
    %28 = arith.mulf %23, %27 : vector<1x16x16x24xf32>
    %29 = arith.addf %22, %28 : vector<1x16x16x24xf32>
    %c0_35 = arith.constant 0 : index
    %c0_36 = arith.constant 0 : index
    %c8_37 = arith.constant 8 : index
    %c0_38 = arith.constant 0 : index
    %30 = vector.load %arg10[%c0_35, %c0_36, %c8_37, %c0_38] : memref<1x18x32x24xf32, #tpu.memory_space<vmem>>, vector<1x16x16x24xf32>
    %c1_39 = arith.constant 1 : index
    %c0_40 = arith.constant 0 : index
    %31 = vector.load %arg5[%c1_39, %c0_40] : memref<9x24xf32, #tpu.memory_space<vmem>>, vector<1x24xf32>
    %32 = vector.shape_cast %31 : vector<1x24xf32> to vector<24xf32>
    %33 = vector.shape_cast %32 : vector<24xf32> to vector<1x1x1x24xf32>
    %34 = vector.broadcast %33 : vector<1x1x1x24xf32> to vector<1x16x16x24xf32>
    %35 = arith.mulf %30, %34 : vector<1x16x16x24xf32>
    %36 = arith.addf %29, %35 : vector<1x16x16x24xf32>
    %c0_41 = arith.constant 0 : index
    %c0_42 = arith.constant 0 : index
    %c9 = arith.constant 9 : index
    %c0_43 = arith.constant 0 : index
    %37 = vector.load %arg10[%c0_41, %c0_42, %c9, %c0_43] : memref<1x18x32x24xf32, #tpu.memory_space<vmem>>, vector<1x16x16x24xf32>
    %c2 = arith.constant 2 : index
    %c0_44 = arith.constant 0 : index
    %38 = vector.load %arg5[%c2, %c0_44] : memref<9x24xf32, #tpu.memory_space<vmem>>, vector<1x24xf32>
    %39 = vector.shape_cast %38 : vector<1x24xf32> to vector<24xf32>
    %40 = vector.shape_cast %39 : vector<24xf32> to vector<1x1x1x24xf32>
    %41 = vector.broadcast %40 : vector<1x1x1x24xf32> to vector<1x16x16x24xf32>
    %42 = arith.mulf %37, %41 : vector<1x16x16x24xf32>
    %43 = arith.addf %36, %42 : vector<1x16x16x24xf32>
    %c0_45 = arith.constant 0 : index
    %c1_46 = arith.constant 1 : index
    %c7_47 = arith.constant 7 : index
    %c0_48 = arith.constant 0 : index
    %44 = vector.load %arg10[%c0_45, %c1_46, %c7_47, %c0_48] : memref<1x18x32x24xf32, #tpu.memory_space<vmem>>, vector<1x16x16x24xf32>
    %c3 = arith.constant 3 : index
    %c0_49 = arith.constant 0 : index
    %45 = vector.load %arg5[%c3, %c0_49] : memref<9x24xf32, #tpu.memory_space<vmem>>, vector<1x24xf32>
    %46 = vector.shape_cast %45 : vector<1x24xf32> to vector<24xf32>
    %47 = vector.shape_cast %46 : vector<24xf32> to vector<1x1x1x24xf32>
    %48 = vector.broadcast %47 : vector<1x1x1x24xf32> to vector<1x16x16x24xf32>
    %49 = arith.mulf %44, %48 : vector<1x16x16x24xf32>
    %50 = arith.addf %43, %49 : vector<1x16x16x24xf32>
    %c0_50 = arith.constant 0 : index
    %c1_51 = arith.constant 1 : index
    %c8_52 = arith.constant 8 : index
    %c0_53 = arith.constant 0 : index
    %51 = vector.load %arg10[%c0_50, %c1_51, %c8_52, %c0_53] : memref<1x18x32x24xf32, #tpu.memory_space<vmem>>, vector<1x16x16x24xf32>
    %c4 = arith.constant 4 : index
    %c0_54 = arith.constant 0 : index
    %52 = vector.load %arg5[%c4, %c0_54] : memref<9x24xf32, #tpu.memory_space<vmem>>, vector<1x24xf32>
    %53 = vector.shape_cast %52 : vector<1x24xf32> to vector<24xf32>
    %54 = vector.shape_cast %53 : vector<24xf32> to vector<1x1x1x24xf32>
    %55 = vector.broadcast %54 : vector<1x1x1x24xf32> to vector<1x16x16x24xf32>
    %56 = arith.mulf %51, %55 : vector<1x16x16x24xf32>
    %57 = arith.addf %50, %56 : vector<1x16x16x24xf32>
    %c0_55 = arith.constant 0 : index
    %c1_56 = arith.constant 1 : index
    %c9_57 = arith.constant 9 : index
    %c0_58 = arith.constant 0 : index
    %58 = vector.load %arg10[%c0_55, %c1_56, %c9_57, %c0_58] : memref<1x18x32x24xf32, #tpu.memory_space<vmem>>, vector<1x16x16x24xf32>
    %c5 = arith.constant 5 : index
    %c0_59 = arith.constant 0 : index
    %59 = vector.load %arg5[%c5, %c0_59] : memref<9x24xf32, #tpu.memory_space<vmem>>, vector<1x24xf32>
    %60 = vector.shape_cast %59 : vector<1x24xf32> to vector<24xf32>
    %61 = vector.shape_cast %60 : vector<24xf32> to vector<1x1x1x24xf32>
    %62 = vector.broadcast %61 : vector<1x1x1x24xf32> to vector<1x16x16x24xf32>
    %63 = arith.mulf %58, %62 : vector<1x16x16x24xf32>
    %64 = arith.addf %57, %63 : vector<1x16x16x24xf32>
    %c0_60 = arith.constant 0 : index
    %c2_61 = arith.constant 2 : index
    %c7_62 = arith.constant 7 : index
    %c0_63 = arith.constant 0 : index
    %65 = vector.load %arg10[%c0_60, %c2_61, %c7_62, %c0_63] : memref<1x18x32x24xf32, #tpu.memory_space<vmem>>, vector<1x16x16x24xf32>
    %c6 = arith.constant 6 : index
    %c0_64 = arith.constant 0 : index
    %66 = vector.load %arg5[%c6, %c0_64] : memref<9x24xf32, #tpu.memory_space<vmem>>, vector<1x24xf32>
    %67 = vector.shape_cast %66 : vector<1x24xf32> to vector<24xf32>
    %68 = vector.shape_cast %67 : vector<24xf32> to vector<1x1x1x24xf32>
    %69 = vector.broadcast %68 : vector<1x1x1x24xf32> to vector<1x16x16x24xf32>
    %70 = arith.mulf %65, %69 : vector<1x16x16x24xf32>
    %71 = arith.addf %64, %70 : vector<1x16x16x24xf32>
    %c0_65 = arith.constant 0 : index
    %c2_66 = arith.constant 2 : index
    %c8_67 = arith.constant 8 : index
    %c0_68 = arith.constant 0 : index
    %72 = vector.load %arg10[%c0_65, %c2_66, %c8_67, %c0_68] : memref<1x18x32x24xf32, #tpu.memory_space<vmem>>, vector<1x16x16x24xf32>
    %c7_69 = arith.constant 7 : index
    %c0_70 = arith.constant 0 : index
    %73 = vector.load %arg5[%c7_69, %c0_70] : memref<9x24xf32, #tpu.memory_space<vmem>>, vector<1x24xf32>
    %74 = vector.shape_cast %73 : vector<1x24xf32> to vector<24xf32>
    %75 = vector.shape_cast %74 : vector<24xf32> to vector<1x1x1x24xf32>
    %76 = vector.broadcast %75 : vector<1x1x1x24xf32> to vector<1x16x16x24xf32>
    %77 = arith.mulf %72, %76 : vector<1x16x16x24xf32>
    %78 = arith.addf %71, %77 : vector<1x16x16x24xf32>
    %c0_71 = arith.constant 0 : index
    %c2_72 = arith.constant 2 : index
    %c9_73 = arith.constant 9 : index
    %c0_74 = arith.constant 0 : index
    %79 = vector.load %arg10[%c0_71, %c2_72, %c9_73, %c0_74] : memref<1x18x32x24xf32, #tpu.memory_space<vmem>>, vector<1x16x16x24xf32>
    %c8_75 = arith.constant 8 : index
    %c0_76 = arith.constant 0 : index
    %80 = vector.load %arg5[%c8_75, %c0_76] : memref<9x24xf32, #tpu.memory_space<vmem>>, vector<1x24xf32>
    %81 = vector.shape_cast %80 : vector<1x24xf32> to vector<24xf32>
    %82 = vector.shape_cast %81 : vector<24xf32> to vector<1x1x1x24xf32>
    %83 = vector.broadcast %82 : vector<1x1x1x24xf32> to vector<1x16x16x24xf32>
    %84 = arith.mulf %79, %83 : vector<1x16x16x24xf32>
    %85 = arith.addf %78, %84 : vector<1x16x16x24xf32>
    %c0_77 = arith.constant 0 : index
    %c0_78 = arith.constant 0 : index
    %86 = vector.load %arg6[%c0_77, %c0_78] : memref<1x24xf32, #tpu.memory_space<vmem>>, vector<1x24xf32>
    %87 = vector.shape_cast %86 : vector<1x24xf32> to vector<24xf32>
    %88 = vector.shape_cast %87 : vector<24xf32> to vector<1x1x1x24xf32>
    %89 = vector.broadcast %88 : vector<1x1x1x24xf32> to vector<1x16x16x24xf32>
    %90 = arith.addf %85, %89 : vector<1x16x16x24xf32>
    %cst_79 = arith.constant 0.000000e+00 : f32
    %cst_80 = arith.constant 6.000000e+00 : f32
    %91 = vector.broadcast %cst_79 : f32 to vector<1x16x16x24xf32>
    %92 = arith.maximumf %91, %90 : vector<1x16x16x24xf32>
    %93 = vector.broadcast %cst_80 : f32 to vector<1x16x16x24xf32>
    %94 = arith.minimumf %93, %92 : vector<1x16x16x24xf32>
    %c0_81 = arith.constant 0 : index
    %c0_82 = arith.constant 0 : index
    %95 = vector.load %arg7[%c0_81, %c0_82] : memref<4x24xbf16, #tpu.memory_space<vmem>>, vector<4x24xbf16>
    %96 = vector.shape_cast %94 : vector<1x16x16x24xf32> to vector<256x24xf32>
    %97 = arith.truncf %96 : vector<256x24xf32> to vector<256x24xbf16>
    %cst_83 = arith.constant dense<0.000000e+00> : vector<4x256xf32>
    %98 = tpu.matmul %95, %97, %cst_83 {dimension_numbers = #tpu.dot_dimension_numbers<[1], [1], [0], [0], [0, 0, 1, 0], [], []>} : vector<4x24xbf16>, vector<256x24xbf16>, vector<4x256xf32> -> vector<4x256xf32>
    %c0_84 = arith.constant 0 : index
    %c0_85 = arith.constant 0 : index
    %99 = vector.load %arg8[%c0_84, %c0_85] : memref<4x1xf32, #tpu.memory_space<vmem>>, vector<4x1xf32>
    %100 = vector.broadcast %99 : vector<4x1xf32> to vector<4x256xf32>
    %101 = arith.addf %98, %100 : vector<4x256xf32>
    %cst_86 = arith.constant 0.000000e+00 : f32
    %cst_87 = arith.constant 6.000000e+00 : f32
    %102 = vector.broadcast %cst_86 : f32 to vector<4x256xf32>
    %103 = arith.maximumf %102, %101 : vector<4x256xf32>
    %104 = vector.broadcast %cst_87 : f32 to vector<4x256xf32>
    %105 = arith.minimumf %104, %103 : vector<4x256xf32>
    %c0_88 = arith.constant 0 : index
    %c0_89 = arith.constant 0 : index
    %c0_90 = arith.constant 0 : index
    %106 = vector.load %arg2[%c0_88, %c0_89, %c0_90] : memref<1x4x256xf32, #tpu.memory_space<vmem>>, vector<1x4x256xf32>
    %107 = vector.shape_cast %106 : vector<1x4x256xf32> to vector<4x256xf32>
    %108 = arith.addf %105, %107 : vector<4x256xf32>
    %c0_91 = arith.constant 0 : index
    %c0_92 = arith.constant 0 : index
    %c0_93 = arith.constant 0 : index
    %109 = vector.load %arg9[%c0_91, %c0_92, %c0_93] : memref<1x4x256xf32, #tpu.memory_space<vmem>>, vector<1x4x256xf32>
    %110 = vector.shape_cast %109 : vector<1x4x256xf32> to vector<4x256xf32>
    %111 = vector.shape_cast %108 : vector<4x256xf32> to vector<1x4x256xf32>
    tpu.vector_store %arg9[%c0_91, %c0_92, %c0_93], %111 {strides = array<i32>} : memref<1x4x256xf32, #tpu.memory_space<vmem>>, vector<1x4x256xf32>,
    return
  }
  func.func @transform_0(%arg0: i32) -> (i32, i32, i32, i32) {
    %c0_i32 = arith.constant 0 : i32
    %c0_i32_0 = arith.constant 0 : i32
    %c0_i32_1 = arith.constant 0 : i32
    %c0_i32_2 = arith.constant 0 : i32
    return %arg0, %c0_i32, %c0_i32_0, %c0_i32_1 : i32, i32, i32, i32
  }
  func.func @transform_1(%arg0: i32) -> (i32, i32, i32) {
    %c0_i32 = arith.constant 0 : i32
    %c0_i32_0 = arith.constant 0 : i32
    %c0_i32_1 = arith.constant 0 : i32
    return %arg0, %c0_i32, %c0_i32_0 : i32, i32, i32
  }
  func.func @transform_2(%arg0: i32) -> (i32, i32) {
    %c0_i32 = arith.constant 0 : i32
    %c0_i32_0 = arith.constant 0 : i32
    %c0_i32_1 = arith.constant 0 : i32
    return %c0_i32, %c0_i32_0 : i32, i32
  }
  func.func @transform_3(%arg0: i32) -> (i32, i32) {
    %c0_i32 = arith.constant 0 : i32
    %c0_i32_0 = arith.constant 0 : i32
    %c0_i32_1 = arith.constant 0 : i32
    return %c0_i32, %c0_i32_0 : i32, i32
  }
  func.func @transform_4(%arg0: i32) -> (i32, i32) {
    %c0_i32 = arith.constant 0 : i32
    %c0_i32_0 = arith.constant 0 : i32
    %c0_i32_1 = arith.constant 0 : i32
    return %c0_i32, %c0_i32_0 : i32, i32
  }
  func.func @transform_5(%arg0: i32) -> (i32, i32) {
    %c0_i32 = arith.constant 0 : i32
    %c0_i32_0 = arith.constant 0 : i32
    %c0_i32_1 = arith.constant 0 : i32
    return %c0_i32, %c0_i32_0 : i32, i32
  }
  func.func @transform_6(%arg0: i32) -> (i32, i32) {
    %c0_i32 = arith.constant 0 : i32
    %c0_i32_0 = arith.constant 0 : i32
    %c0_i32_1 = arith.constant 0 : i32
    return %c0_i32, %c0_i32_0 : i32, i32
  }
  func.func @transform_7(%arg0: i32) -> (i32, i32) {
    %c0_i32 = arith.constant 0 : i32
    %c0_i32_0 = arith.constant 0 : i32
    %c0_i32_1 = arith.constant 0 : i32
    return %c0_i32, %c0_i32_0 : i32, i32
  }
  func.func @transform_8(%arg0: i32) -> (i32, i32, i32) {
    %c0_i32 = arith.constant 0 : i32
    %c0_i32_0 = arith.constant 0 : i32
    %c0_i32_1 = arith.constant 0 : i32
    return %arg0, %c0_i32, %c0_i32_0 : i32, i32, i32
  }
}

</mosaic_0001>

<bundles_post_ra>
// kernel: inverted_block_v2.1
= control target key start
LH: loop header
LB: loop body
LE: loop exit
PB: predicated region body
PF: predicated region fallthrough
CT: control target
= control target key end

     0   :  { %s2150_s27 = smov 0   ;;  %s3217_s0 = inlined_call_operand.vmem [shape: f32[2,16,16,4], index: 0, kind: input, shape index: {}]   ;;  %s3218_s1 = inlined_call_operand.vmem [shape: f32[2,4,256], index: 1, kind: input, shape index: {}]   ;;  %s3219_s2 = inlined_call_operand.vmem [shape: bf16[4,24], index: 2, kind: input, shape index: {}]   ;;  %s3220_s3 = inlined_call_operand.vmem [shape: f32[1,24], index: 3, kind: input, shape index: {}]   ;;  %s3221_s4 = inlined_call_operand.vmem [shape: f32[9,24], index: 4, kind: input, shape index: {}]   ;;  %s3222_s5 = inlined_call_operand.vmem [shape: f32[1,24], index: 5, kind: input, shape index: {}]   ;;  %s3223_s6 = inlined_call_operand.vmem [shape: bf16[4,24], index: 6, kind: input, shape index: {}]   ;;  %s3224_s7 = inlined_call_operand.vmem [shape: f32[4,1], index: 7, kind: input, shape index: {}]   ;;  %s3225_s8 = inlined_call_operand.vmem [shape: f32[2,4,256], index: 8, kind: output, shape index: {}]  }
   0x1 LB: > { %s1950_s28 = sadd.s32 4294967295, %s2101_s27   ;;  %p1954_p0 = scmp.ge.s32.totalorder %s2101_s27, 1  ;;  %s2101_s27 = sphi %s2150_s27, %s18_s27  }
   0x2   : > { %p272_p1 = scmp.lt.s32.totalorder %s2101_s27, 3 }
   0x4   : > { %p273_p2 = pnand %p1954_p0, %p272_p1 }
   0x6   : > { %276 = sbr.rel (%p273_p2) target bundleno = 675 (0x2a3), region = 52 }
   0xd   : > { %v421_v0 = vld [vmem:[%s3219_s2] sm:$0x3]  ;;  %vm478_vm0 = vcmask 1041408   ;;  %p311_p3 = scmp.lt.s32.totalorder %s1950_s28, 1  ;;  %vm429_vm1 = vcmask 31744   ;;  %vm364_vm2 = vcmask 195584  }
   0xe   : > { %2063 = vmatprep.subr.msk.bf16.mxu0 %vm478_vm0, %v421_v0  ;;  %v480_v1 = vsel %vm478_vm0, %v421_v0, 0  ;;  %vm327_vm3 = vcmask 188416   ;;  %v2103_v50 = vmov 0.0   ;;  %vm367_vm4 = vcmask 189440   ;;  %v2260_v51 = vld [vmem:[%s3220_s3] ss:$0 sm:$0xff] }
   0xf   : > { %2030 = vmatpush3.bf16.msra.mxu0 %v480_v1  ;;  %s3244_s28 = smov (!%p311_p3, %s1950_s28), 1  ;;  %336 = vst.msk [vmem:[#allocation2 + $0x107] sm:$0x1] %vm327_vm3, %v2103_v50  ;;  %337 = vst.msk [vmem:[#allocation2 + $0x127] sm:$0x1] %vm327_vm3, %v2103_v50 }
  0x10   : > { %s1991_s9 = sshll.u32 %s3244_s28, 8  ;;  %338 = vst.msk [vmem:[#allocation2 + $0x147] sm:$0x1] %vm327_vm3, %v2103_v50  ;;  %354 = vst.msk [vmem:[#allocation2 + $0x118] sm:$0x1] %vm327_vm3, %v2103_v50  ;;  %s1992_s21 = sshll.u32 %s3244_s28, 3 }
  0x11   : > { %s2167_s12 = scalar_lea.vmem %s3217_s0, %s1991_s9  ;;  %355 = vst.msk [vmem:[#allocation2 + $0x138] sm:$0x1] %vm327_vm3, %v2103_v50  ;;  %356 = vst.msk [vmem:[#allocation2 + $0x158] sm:$0x1] %vm327_vm3, %v2103_v50  ;;  %v2266_v55 = vld [vmem:[%s3221_s4] ss:$0 sm:$0xff]  ;;  %s320_s24 = scalar_lea.vmem %s3218_s1, %s1992_s21 }
  0x12   : > { %v373_v2 = vld [vmem:[%s2167_s12] sm:$0xff]  ;;  %v374_v3 = vld [vmem:[%s2167_s12 + $0x8] sm:$0xff]  ;;  %v375_v4 = vld [vmem:[%s2167_s12 + $0x10] sm:$0xff]  ;;  %328 = vst.msk [vmem:[#allocation2 + $0x7] sm:$0x1] %vm327_vm3, %v2103_v50  ;;  %s325_s26 = scalar_lea.vmem %s3225_s8, %s1992_s21 }
  0x13   : > { %v405_v5 = vpack.c.bf16 %v374_v3, %v373_v2  ;;  %v376_v6 = vld [vmem:[%s2167_s12 + $0x18] sm:$0xff]  ;;  %v377_v7 = vld [vmem:[%s2167_s12 + $0x20] sm:$0xff]  ;;  %v378_v8 = vld [vmem:[%s2167_s12 + $0x28] sm:$0xff]  ;;  %329 = vst.msk [vmem:[#allocation2 + $0x27] sm:$0x1] %vm327_vm3, %v2103_v50 }
  0x14   : > { %v406_v9 = vpack.c.bf16 %v376_v6, %v375_v4  ;;  %v407_v10 = vpack.c.bf16 %v378_v8, %v377_v7  ;;  %v379_v11 = vld [vmem:[%s2167_s12 + $0x30] sm:$0xff]  ;;  %v380_v12 = vld [vmem:[%s2167_s12 + $0x38] sm:$0xff]  ;;  %v381_v13 = vld [vmem:[%s2167_s12 + $0x40] sm:$0xff]  ;;  %330 = vst.msk [vmem:[#allocation2 + $0x47] sm:$0x1] %vm327_vm3, %v2103_v50 }
  0x15   : > { %2031 = vmatprep.mubr.msk.bf16.mxu0 %vm429_vm1, %v405_v5  ;;  %v382_v14 = vld [vmem:[%s2167_s12 + $0x48] sm:$0xff]  ;;  %v408_v15 = vpack.c.bf16 %v380_v12, %v379_v11  ;;  %v383_v17 = vld [vmem:[%s2167_s12 + $0x50] sm:$0xff]  ;;  %v384_v18 = vld [vmem:[%s2167_s12 + $0x58] sm:$0xff]  ;;  %331 = vst.msk [vmem:[#allocation2 + $0x67] sm:$0x1] %vm327_vm3, %v2103_v50 }
  0x16   : > { %2032 = vmatmul.mubr.msk.bf16.vlgmr.msra.gmra.mrb[0].mxu0 %vm429_vm1, %v406_v9  ;;  %v409_v16 = vpack.c.bf16 %v382_v14, %v381_v13  ;;  %v385_v19 = vld [vmem:[%s2167_s12 + $0x60] sm:$0xff]  ;;  %v386_v20 = vld [vmem:[%s2167_s12 + $0x68] sm:$0xff]  ;;  %v410_v21 = vpack.c.bf16 %v384_v18, %v383_v17  ;;  %v387_v23 = vld [vmem:[%s2167_s12 + $0x70] sm:$0xff]  ;;  %332 = vst.msk [vmem:[#allocation2 + $0x87] sm:$0x1] %vm327_vm3, %v2103_v50 }
  0x17   : > { %2035 = vmatprep.mubr.msk.bf16.mxu0 %vm429_vm1, %v407_v10  ;;  %v411_v22 = vpack.c.bf16 %v386_v20, %v385_v19  ;;  %v388_v24 = vld [vmem:[%s2167_s12 + $0x78] sm:$0xff]  ;;  %v389_v25 = vld [vmem:[%s2167_s12 + $0x80] sm:$0xff]  ;;  %v390_v26 = vld [vmem:[%s2167_s12 + $0x88] sm:$0xff]  ;;  %333 = vst.msk [vmem:[#allocation2 + $0xa7] sm:$0x1] %vm327_vm3, %v2103_v50 }
  0x18   : > { %v412_v27 = vpack.c.bf16 %v388_v24, %v387_v23  ;;  %v413_v28 = vpack.c.bf16 %v390_v26, %v389_v25  ;;  %v391_v29 = vld [vmem:[%s2167_s12 + $0x90] sm:$0xff]  ;;  %v392_v30 = vld [vmem:[%s2167_s12 + $0x98] sm:$0xff]  ;;  %v393_v31 = vld [vmem:[%s2167_s12 + $0xa0] sm:$0xff]  ;;  %334 = vst.msk [vmem:[#allocation2 + $0xc7] sm:$0x1] %vm327_vm3, %v2103_v50 }
  0x19   : > { %v394_v32 = vld [vmem:[%s2167_s12 + $0xa8] sm:$0xff]  ;;  %v414_v33 = vpack.c.bf16 %v392_v30, %v391_v29  ;;  %v395_v35 = vld [vmem:[%s2167_s12 + $0xb0] sm:$0xff]  ;;  %v396_v36 = vld [vmem:[%s2167_s12 + $0xb8] sm:$0xff]  ;;  %335 = vst.msk [vmem:[#allocation2 + $0xe7] sm:$0x1] %vm327_vm3, %v2103_v50 }
  0x1a   : > { %v415_v34 = vpack.c.bf16 %v394_v32, %v393_v31  ;;  %v397_v37 = vld [vmem:[%s2167_s12 + $0xc0] sm:$0xff]  ;;  %v398_v38 = vld [vmem:[%s2167_s12 + $0xc8] sm:$0xff]  ;;  %v416_v39 = vpack.c.bf16 %v396_v36, %v395_v35  ;;  %v399_v41 = vld [vmem:[%s2167_s12 + $0xd0] sm:$0xff]  ;;  %339 = vst.msk [vmem:[#allocation2 + $0x167] sm:$0x1] %vm327_vm3, %v2103_v50 }
  0x1b   : > { %v417_v40 = vpack.c.bf16 %v398_v38, %v397_v37  ;;  %v400_v42 = vld [vmem:[%s2167_s12 + $0xd8] sm:$0xff]  ;;  %v401_v43 = vld [vmem:[%s2167_s12 + $0xe0] sm:$0xff]  ;;  %v402_v44 = vld [vmem:[%s2167_s12 + $0xe8] sm:$0xff]  ;;  %340 = vst.msk [vmem:[#allocation2 + $0x187] sm:$0x1] %vm327_vm3, %v2103_v50 }
  0x1c   : > { %v418_v45 = vpack.c.bf16 %v400_v42, %v399_v41  ;;  %v419_v46 = vpack.c.bf16 %v402_v44, %v401_v43  ;;  %v403_v47 = vld [vmem:[%s2167_s12 + $0xf0] sm:$0xff]  ;;  %v404_v48 = vld [vmem:[%s2167_s12 + $0xf8] sm:$0xff]  ;;  %341 = vst.msk [vmem:[#allocation2 + $0x1a7] sm:$0x1] %vm327_vm3, %v2103_v50  ;;  %342 = vst.msk [vmem:[#allocation2 + $0x1c7] sm:$0x1] %vm327_vm3, %v2103_v50 }
  0x1d   : > { %v420_v49 = vpack.c.bf16 %v404_v48, %v403_v47  ;;  %343 = vst.msk [vmem:[#allocation2 + $0x1e7] sm:$0x1] %vm327_vm3, %v2103_v50  ;;  %344 = vst.msk [vmem:[#allocation2 + $0x207] sm:$0x1] %vm327_vm3, %v2103_v50  ;;  %v2272_v58 = vld [vmem:[%s3221_s4 + $0x1] ss:$0 sm:$0xff] }
  0x1e   : > { %2036 = vmatmul.mubr.msk.bf16.gmra.mrb[4].mxu0 %vm429_vm1, %v408_v15  ;;  %345 = vst.msk [vmem:[#allocation2 + $0x227] sm:$0x1] %vm327_vm3, %v2103_v50  ;;  %346 = vst.msk [vmem:[#allocation2 + $0x18] sm:$0x1] %vm327_vm3, %v2103_v50  ;;  %v2284_v13 = vld [vmem:[%s3221_s4 + $0x2] ss:$0 sm:$0xff] }
  0x1f   : > { %2039 = vmatprep.mubr.msk.bf16.mxu0 %vm429_vm1, %v409_v16  ;;  %347 = vst.msk [vmem:[#allocation2 + $0x38] sm:$0x1] %vm327_vm3, %v2103_v50  ;;  %348 = vst.msk [vmem:[#allocation2 + $0x58] sm:$0x1] %vm327_vm3, %v2103_v50  ;;  %v2297_v29 = vld [vmem:[%s3221_s4 + $0x3] ss:$0 sm:$0xff] }
  0x20   : > { %349 = vst.msk [vmem:[#allocation2 + $0x78] sm:$0x1] %vm327_vm3, %v2103_v50  ;;  %350 = vst.msk [vmem:[#allocation2 + $0x98] sm:$0x1] %vm327_vm3, %v2103_v50  ;;  %v2303_v32 = vld [vmem:[%s3221_s4 + $0x6] ss:$0 sm:$0xff] }
  0x21   : > { %351 = vst.msk [vmem:[#allocation2 + $0xb8] sm:$0x1] %vm327_vm3, %v2103_v50  ;;  %352 = vst.msk [vmem:[#allocation2 + $0xd8] sm:$0x1] %vm327_vm3, %v2103_v50  ;;  %v2313_v36 = vld [vmem:[%s3221_s4 + $0x4] ss:$0 sm:$0xff] }
  0x22   : > { %353 = vst.msk [vmem:[#allocation2 + $0xf8] sm:$0x1] %vm327_vm3, %v2103_v50  ;;  %357 = vst.msk [vmem:[#allocation2 + $0x178] sm:$0x1] %vm327_vm3, %v2103_v50 }
  0x23   : > { %358 = vst.msk [vmem:[#allocation2 + $0x198] sm:$0x1] %vm327_vm3, %v2103_v50  ;;  %359 = vst.msk [vmem:[#allocation2 + $0x1b8] sm:$0x1] %vm327_vm3, %v2103_v50 }
  0x24   : > { %360 = vst.msk [vmem:[#allocation2 + $0x1d8] sm:$0x1] %vm327_vm3, %v2103_v50  ;;  %361 = vst.msk [vmem:[#allocation2 + $0x1f8] sm:$0x1] %vm327_vm3, %v2103_v50 }
  0x25   : > { %362 = vst.msk [vmem:[#allocation2 + $0x218] sm:$0x1] %vm327_vm3, %v2103_v50  ;;  %363 = vst.msk [vmem:[#allocation2 + $0x238] sm:$0x1] %vm327_vm3, %v2103_v50 }
  0x26   : > { %2040 = vmatmul.mubr.msk.bf16.gmra.mrb[8].mxu0 %vm429_vm1, %v410_v21  ;;  %366 = vst.msk [vmem:[#allocation2 + $0xf] sm:$0xff] %vm364_vm2, %v2103_v50  ;;  %371 = vst.msk [vmem:[#allocation2 + $0x22f] sm:$0xff] %vm364_vm2, %v2103_v50 }
  0x27   : > { %2043 = vmatprep.mubr.msk.bf16.mxu0 %vm429_vm1, %v411_v22  ;;  %365 = vst.msk [vmem:[#allocation2 + $0x7] sm:$0xff] %vm364_vm2, %v2103_v50  ;;  %370 = vst.msk [vmem:[#allocation2 + $0x227] sm:$0xff] %vm364_vm2, %v2103_v50 }
  0x28   : > { %368 = vst.msk [vmem:[#allocation2 + $0x17] sm:$0x3] %vm367_vm4, %v2103_v50  ;;  %372 = vst.msk [vmem:[#allocation2 + $0x237] sm:$0x3] %vm367_vm4, %v2103_v50 }
  0x2d   : > { %v741_v0 = vld [vmem:[#allocation2 + $0xf] sm:$0xff] }
  0x2e   : > { %2044 = vmatmul.mubr.msk.bf16.gmra.mrb[12].mxu0 %vm429_vm1, %v412_v27  ;;  %v740_v59 = vld [vmem:[#allocation2 + $0x7] sm:$0xff]  ;;  %v778_v10 = vmul.f32 %v2266_v55, %v741_v0 }
  0x2f   : > { %2047 = vmatprep.mubr.msk.bf16.mxu0 %vm429_vm1, %v413_v28  ;;  %v841_v60 = vld [vmem:[#allocation2 + $0x8] sm:$0xff]  ;;  %v842_v1 = vld [vmem:[#allocation2 + $0x10] sm:$0xff]  ;;  %v777_v6 = vmul.f32 %v2266_v55, %v740_v59 }
  0x30   : > { %v878_v7 = vmul.f32 %v2272_v58, %v841_v60  ;;  %v879_v11 = vmul.f32 %v2272_v58, %v842_v1  ;;  %v942_v14 = vld [vmem:[#allocation2 + $0x9] sm:$0xff]  ;;  %v943_v15 = vld [vmem:[#allocation2 + $0x11] sm:$0xff] }
  0x31   : > { %v979_v24 = vmul.f32 %v2284_v13, %v942_v14  ;;  %v980_v25 = vmul.f32 %v2284_v13, %v943_v15 }
  0x32   : > { %v910_v20 = vadd.f32 %v878_v7, %v777_v6  ;;  %v911_v23 = vadd.f32 %v879_v11, %v778_v10 }
  0x34   : > { %v1012_v41 = vadd.f32 %v980_v25, %v911_v23 }
  0x36   : > { %2048 = vmatmul.mubr.msk.bf16.gmra.mrb[16].mxu0 %vm429_vm1, %v414_v33  ;;  %v2308_v33 = vld [vmem:[%s3221_s4 + $0x7] ss:$0 sm:$0xff] }
  0x37   : > { %2051 = vmatprep.mubr.msk.bf16.mxu0 %vm429_vm1, %v415_v34 }
  0x3e   : > { %2052 = vmatmul.mubr.msk.bf16.gmra.mrb[20].mxu0 %vm429_vm1, %v416_v39  ;;  %v2318_v39 = vld [vmem:[%s3221_s4 + $0x8] ss:$0 sm:$0xff] }
  0x3f   : > { %2055 = vmatprep.mubr.msk.bf16.mxu0 %vm429_vm1, %v417_v40  ;;  %v1011_v40 = vadd.f32 %v979_v24, %v910_v20 }
  0x46   : > { %2056 = vmatmul.mubr.msk.bf16.gmra.mrb[24].mxu0 %vm429_vm1, %v418_v45  ;;  %v2328_v45 = vld [vmem:[%s3221_s4 + $0x5] ss:$0 sm:$0xff] }
  0x47   : > { %2059 = vmatprep.mubr.msk.bf16.mxu0 %vm429_vm1, %v419_v46 }
  0x4e   : > { %2060 = vmatmul.mubr.msk.bf16.gmra.mrb[28].mxu0 %vm429_vm1, %v420_v49 }
  0xe9   : > { %v2033_v52 = vpop.f32.mrb[0].mxu0 }
  0xea   : > { %v525_v53 = vadd.f32 %v2033_v52, %v2260_v51  ;;  %v516_v54 = vpop.f32.mrb[1].mxu0 }
  0xeb   : > { %v517_v56 = vadd.f32 %v2260_v51, %v516_v54  ;;  %v2034_v57 = vpop.f32.mrb[2].mxu0 }
  0xec   : > { %v645_v61 = vmax.f32 %v525_v53, 0.0  ;;  %v528_v62 = vadd.f32 %v2034_v57, %v2260_v51  ;;  %v519_v63 = vpop.f32.mrb[3].mxu0 }
  0xed   : > { %v643_v2 = vmax.f32 %v517_v56, 0.0  ;;  %v520_v3 = vadd.f32 %v2260_v51, %v519_v63 }
  0xee   : > { %v677_v4 = vmin.f32 %v645_v61, 6.0  ;;  %v646_v5 = vmax.f32 %v528_v62, 0.0 }
  0xef   : > { %v675_v8 = vmin.f32 %v643_v2, 6.0  ;;  %v644_v9 = vmax.f32 %v520_v3, 0.0 }
  0xf0   : > { %710 = vst.msk [vmem:[#allocation2 + $0x48] sm:$0xff] %vm364_vm2, %v677_v4  ;;  %v678_v12 = vmin.f32 %v646_v5, 6.0 }
  0xf1   : > { %708 = vst.msk [vmem:[#allocation2 + $0x28] sm:$0xff] %vm364_vm2, %v675_v8  ;;  %v676_v16 = vmin.f32 %v644_v9, 6.0  ;;  %v2037_v17 = vpop.f32.mrb[4].mxu0 }
  0xf2   : > { %711 = vst.msk [vmem:[#allocation2 + $0x50] sm:$0xff] %vm364_vm2, %v678_v12  ;;  %v541_v18 = vadd.f32 %v2037_v17, %v2260_v51  ;;  %v532_v19 = vpop.f32.mrb[5].mxu0 }
  0xf3   : > { %709 = vst.msk [vmem:[#allocation2 + $0x30] sm:$0xff] %vm364_vm2, %v676_v16  ;;  %v533_v21 = vadd.f32 %v2260_v51, %v532_v19  ;;  %v2038_v22 = vpop.f32.mrb[6].mxu0 }
  0xf4   : > { %v649_v26 = vmax.f32 %v541_v18, 0.0  ;;  %v544_v27 = vadd.f32 %v2038_v22, %v2260_v51  ;;  %v535_v28 = vpop.f32.mrb[7].mxu0 }
  0xf5   : > { %v647_v30 = vmax.f32 %v533_v21, 0.0  ;;  %v536_v31 = vadd.f32 %v2260_v51, %v535_v28 }
  0xf6   : > { %v681_v34 = vmin.f32 %v649_v26, 6.0  ;;  %v650_v35 = vmax.f32 %v544_v27, 0.0 }
  0xf7   : > { %v679_v37 = vmin.f32 %v647_v30, 6.0  ;;  %v648_v38 = vmax.f32 %v536_v31, 0.0  ;;  %v2320_v42 = vld [vmem:[#allocation2 + $0x47] sm:$0xff] }
  0xf8   : > { %v2322_v43 = vld [vmem:[#allocation2 + $0x48] sm:$0xff]  ;;  %714 = vst.msk [vmem:[#allocation2 + $0x88] sm:$0xff] %vm364_vm2, %v681_v34  ;;  %v682_v44 = vmin.f32 %v650_v35, 6.0  ;;  %v1384_v48 = vmul.f32 %v2303_v32, %v2320_v42  ;;  %v2338_v50 = vmul.f32 %v2297_v29, %v2320_v42 }
  0xf9   : > { %v1043_v46 = vld [vmem:[#allocation2 + $0x27] sm:$0xff]  ;;  %v2334_v49 = vmul.f32 %v2308_v33, %v2322_v43  ;;  %712 = vst.msk [vmem:[#allocation2 + $0x68] sm:$0xff] %vm364_vm2, %v679_v37  ;;  %v680_v52 = vmin.f32 %v648_v38, 6.0  ;;  %v2041_v53 = vpop.f32.mrb[8].mxu0  ;;  %v2343_v57 = vld [vmem:[#allocation2 + $0x4f] sm:$0xff] }
  0xfa   : > { %v1144_v47 = vld [vmem:[#allocation2 + $0x28] sm:$0xff]  ;;  %v1080_v54 = vmul.f32 %v2297_v29, %v1043_v46  ;;  %v2345_v59 = vld [vmem:[#allocation2 + $0x50] sm:$0xff]  ;;  %v779_v61 = vmul.f32 %v2266_v55, %v1043_v46  ;;  %715 = vst.msk [vmem:[#allocation2 + $0x90] sm:$0xff] %vm364_vm2, %v682_v44  ;;  %v557_v62 = vadd.f32 %v2041_v53, %v2260_v51  ;;  %v548_v63 = vpop.f32.mrb[9].mxu0  ;;  %v1385_v3 = vmul.f32 %v2303_v32, %v2343_v57 }
  0xfb   : > { %v1181_v56 = vmul.f32 %v2313_v36, %v1144_v47  ;;  %v2347_v60 = vld [vmem:[#allocation2 + $0x49] sm:$0xff]  ;;  %v1486_v4 = vmul.f32 %v2308_v33, %v2345_v59  ;;  %713 = vst.msk [vmem:[#allocation2 + $0x70] sm:$0xff] %vm364_vm2, %v680_v52  ;;  %v549_v6 = vadd.f32 %v2260_v51, %v548_v63  ;;  %v2042_v7 = vpop.f32.mrb[10].mxu0  ;;  %v1246_v11 = vld [vmem:[#allocation2 + $0x31] sm:$0xff]  ;;  %v880_v35 = vmul.f32 %v2272_v58, %v1144_v47 }
  0xfc   : > { %v1044_v0 = vld [vmem:[#allocation2 + $0x2f] sm:$0xff]  ;;  %v1586_v5 = vmul.f32 %v2318_v39, %v2347_v60  ;;  %v1112_v9 = vadd.f32 %v1080_v54, %v1011_v40  ;;  %v653_v14 = vmax.f32 %v557_v62, 0.0  ;;  %v560_v15 = vadd.f32 %v2042_v7, %v2260_v51  ;;  %v551_v16 = vpop.f32.mrb[11].mxu0 }
  0xfd   : > { %v1145_v1 = vld [vmem:[#allocation2 + $0x30] sm:$0xff]  ;;  %v1081_v8 = vmul.f32 %v2297_v29, %v1044_v0  ;;  %v1283_v18 = vmul.f32 %v2328_v45, %v1246_v11  ;;  %v651_v19 = vmax.f32 %v549_v6, 0.0  ;;  %v552_v20 = vadd.f32 %v2260_v51, %v551_v16 }
  0xfe   : > { %v1245_v2 = vld [vmem:[#allocation2 + $0x29] sm:$0xff]  ;;  %v1182_v10 = vmul.f32 %v2313_v36, %v1145_v1  ;;  %v2362_v12 = vld [vmem:[#allocation2 + $0x51] sm:$0xff]  ;;  %v1213_v22 = vadd.f32 %v1181_v56, %v1112_v9  ;;  %v685_v23 = vmin.f32 %v653_v14, 6.0  ;;  %v654_v24 = vmax.f32 %v560_v15, 0.0 }
  0xff   : > { %v1282_v17 = vmul.f32 %v2328_v45, %v1245_v2  ;;  %v1113_v21 = vadd.f32 %v1081_v8, %v1012_v41  ;;  %v1587_v25 = vmul.f32 %v2318_v39, %v2362_v12  ;;  %v780_v26 = vmul.f32 %v2266_v55, %v1044_v0 }
 0x100   : > { %v683_v27 = vmin.f32 %v651_v19, 6.0  ;;  %v652_v28 = vmax.f32 %v552_v20, 0.0  ;;  %718 = vst.msk [vmem:[#allocation2 + $0xc8] sm:$0xff] %vm364_vm2, %v685_v23  ;;  %v686_v34 = vmin.f32 %v654_v24, 6.0  ;;  %v881_v37 = vmul.f32 %v2272_v58, %v1145_v1  ;;  %v2395_v23 = vld [vmem:[#allocation2 + $0x67] sm:$0xff] }
 0x101   : > { %v1214_v30 = vadd.f32 %v1182_v10, %v1113_v21  ;;  %v1314_v31 = vadd.f32 %v1282_v17, %v1213_v22  ;;  %v981_v38 = vmul.f32 %v2284_v13, %v1245_v2  ;;  %v2045_v41 = vpop.f32.mrb[12].mxu0  ;;  %v982_v52 = vmul.f32 %v2284_v13, %v1246_v11 }
 0x102   : > { %716 = vst.msk [vmem:[#allocation2 + $0xa8] sm:$0xff] %vm364_vm2, %v683_v27  ;;  %v684_v40 = vmin.f32 %v652_v28, 6.0  ;;  %719 = vst.msk [vmem:[#allocation2 + $0xd0] sm:$0xff] %vm364_vm2, %v686_v34  ;;  %v573_v53 = vadd.f32 %v2045_v41, %v2260_v51  ;;  %v564_v54 = vpop.f32.mrb[13].mxu0  ;;  %v912_v56 = vadd.f32 %v880_v35, %v779_v61  ;;  %v913_v62 = vadd.f32 %v881_v37, %v780_v26  ;;  %v2390_v61 = vld [vmem:[%s3222_s5] ss:$0 sm:$0xff] }
 0x103   : > { %v1315_v44 = vadd.f32 %v1283_v18, %v1214_v30  ;;  %v1416_v46 = vadd.f32 %v1384_v48, %v1314_v31  ;;  %v1083_v47 = vmul.f32 %v2297_v29, %v2343_v57  ;;  %v565_v63 = vadd.f32 %v2260_v51, %v564_v54  ;;  %v2046_v0 = vpop.f32.mrb[14].mxu0  ;;  %v2402_v27 = vld [vmem:[#allocation2 + $0x6f] sm:$0xff] }
 0x104   : > { %717 = vst.msk [vmem:[#allocation2 + $0xb0] sm:$0xff] %vm364_vm2, %v684_v40  ;;  %v1183_v2 = vmul.f32 %v2313_v36, %v2322_v43  ;;  %v657_v6 = vmax.f32 %v573_v53, 0.0  ;;  %v576_v7 = vadd.f32 %v2046_v0, %v2260_v51  ;;  %v567_v8 = vpop.f32.mrb[15].mxu0  ;;  %v1013_v9 = vadd.f32 %v981_v38, %v912_v56  ;;  %v2412_v41 = vld [vmem:[#allocation2 + $0x68] sm:$0xff]  ;;  %v2418_v56 = vld [vmem:[#allocation2 + $0x70] sm:$0xff] }
 0x105   : > { %v1417_v1 = vadd.f32 %v1385_v3, %v1315_v44  ;;  %v1517_v48 = vadd.f32 %v2334_v49, %v1416_v46  ;;  %v1014_v10 = vadd.f32 %v982_v52, %v913_v62  ;;  %v655_v11 = vmax.f32 %v565_v63, 0.0  ;;  %3234 = vst [vmem:[#allocation3_spill] sm:$0xff] %v2412_v41  ;;  %3235 = vst [vmem:[#allocation4_spill] sm:$0xff] %v2418_v56 }
 0x106   : > { %v568_v14 = vadd.f32 %v2260_v51, %v567_v8  ;;  %v689_v49 = vmin.f32 %v657_v6, 6.0  ;;  %v658_v16 = vmax.f32 %v576_v7, 0.0  ;;  %v1114_v17 = vadd.f32 %v2338_v50, %v1013_v9 }
 0x107   : > { %v1518_v3 = vadd.f32 %v1486_v4, %v1417_v1  ;;  %v1618_v15 = vadd.f32 %v1586_v5, %v1517_v48  ;;  %v1115_v18 = vadd.f32 %v1083_v47, %v1014_v10  ;;  %v687_v19 = vmin.f32 %v655_v11, 6.0 }
 0x108   : > { %v656_v20 = vmax.f32 %v568_v14, 0.0  ;;  %722 = vst.msk [vmem:[#allocation2 + $0x108] sm:$0xff] %vm364_vm2, %v689_v49  ;;  %v690_v24 = vmin.f32 %v658_v16, 6.0  ;;  %v1184_v26 = vmul.f32 %v2313_v36, %v2345_v59  ;;  %v1215_v4 = vadd.f32 %v1183_v2, %v1114_v17  ;;  %v2426_v14 = vld [vmem:[#allocation2 + $0x69] sm:$0xff] }
 0x109   : > { %v1619_v21 = vadd.f32 %v1587_v25, %v1518_v3  ;;  %v1657_v22 = vadd.f32 %v2390_v61, %v1618_v15  ;;  %v1284_v5 = vmul.f32 %v2328_v45, %v2347_v60  ;;  %720 = vst.msk [vmem:[#allocation2 + $0xe8] sm:$0xff] %vm364_vm2, %v687_v19  ;;  %v2049_v25 = vpop.f32.mrb[16].mxu0  ;;  %v1285_v31 = vmul.f32 %v2328_v45, %v2362_v12  ;;  %v2428_v3 = vld [vmem:[#allocation2 + $0x71] sm:$0xff] }
 0x10a   : > { %v688_v50 = vmin.f32 %v656_v20, 6.0  ;;  %723 = vst.msk [vmem:[#allocation2 + $0x110] sm:$0xff] %vm364_vm2, %v690_v24  ;;  %v589_v34 = vadd.f32 %v2049_v25, %v2260_v51  ;;  %v580_v35 = vpop.f32.mrb[17].mxu0  ;;  %v1216_v37 = vadd.f32 %v1184_v26, %v1115_v18  ;;  %v1386_v40 = vmul.f32 %v2303_v32, %v2395_v23  ;;  %3236 = vst [vmem:[#allocation5_spill] sm:$0xff] %v2426_v14 }
 0x10b   : > { %v1658_v28 = vadd.f32 %v2390_v61, %v1619_v21  ;;  %v1689_v30 = vmax.f32 %v1657_v22, 0.0  ;;  %v1316_v38 = vadd.f32 %v1284_v5, %v1215_v4  ;;  %v581_v44 = vadd.f32 %v2260_v51, %v580_v35  ;;  %v2050_v46 = vpop.f32.mrb[18].mxu0  ;;  %3237 = vst [vmem:[#allocation6_spill] sm:$0xff] %v2428_v3 }
 0x10c   : > { %721 = vst.msk [vmem:[#allocation2 + $0xf0] sm:$0xff] %vm364_vm2, %v688_v50  ;;  %v1387_v54 = vmul.f32 %v2303_v32, %v2402_v27  ;;  %v661_v62 = vmax.f32 %v589_v34, 0.0  ;;  %v592_v47 = vadd.f32 %v2050_v46, %v2260_v51  ;;  %v583_v63 = vpop.f32.mrb[19].mxu0  ;;  %v1317_v0 = vadd.f32 %v1285_v31, %v1216_v37 }
 0x10d   : > { %v1690_v52 = vmax.f32 %v1658_v28, 0.0  ;;  %v1721_v53 = vmin.f32 %v1689_v30, 6.0  ;;  %v1418_v1 = vadd.f32 %v1386_v40, %v1316_v38  ;;  %v659_v48 = vmax.f32 %v581_v44, 0.0 }
 0x10e   : > { %v584_v2 = vadd.f32 %v2260_v51, %v583_v63  ;;  %v1487_v7 = vmul.f32 %v2308_v33, %v2412_v41  ;;  %v693_v8 = vmin.f32 %v661_v62, 6.0  ;;  %v662_v9 = vmax.f32 %v592_v47, 0.0 }
 0x10f   : > { %v1722_v6 = vmin.f32 %v1690_v52, 6.0  ;;  %v1419_v10 = vadd.f32 %v1387_v54, %v1317_v0  ;;  %v1488_v11 = vmul.f32 %v2308_v33, %v2418_v56  ;;  %v691_v15 = vmin.f32 %v659_v48, 6.0  ;;  %v756_v16 = vld [vmem:[#allocation2 + $0x107] sm:$0xff] }
 0x110   : > { %v660_v49 = vmax.f32 %v584_v2, 0.0  ;;  %v857_v17 = vld [vmem:[#allocation2 + $0x108] sm:$0xff]  ;;  %v1519_v19 = vadd.f32 %v1487_v7, %v1418_v1  ;;  %726 = vst.msk [vmem:[#allocation2 + $0x148] sm:$0xff] %vm364_vm2, %v693_v8  ;;  %v694_v20 = vmin.f32 %v662_v9, 6.0  ;;  %v793_v21 = vmul.f32 %v2266_v55, %v756_v16 }
 0x111   : > { %v1754_v18 = vpack.c.bf16 %v1722_v6, %v1721_v53  ;;  %v894_v22 = vmul.f32 %v2272_v58, %v857_v17  ;;  %v1520_v24 = vadd.f32 %v1488_v11, %v1419_v10  ;;  %724 = vst.msk [vmem:[#allocation2 + $0x128] sm:$0xff] %vm364_vm2, %v691_v15  ;;  %v2053_v4 = vpop.f32.mrb[20].mxu0  ;;  %v757_v5 = vld [vmem:[#allocation2 + $0x10f] sm:$0xff]  ;;  %v1588_v30 = vmul.f32 %v2318_v39, %v2426_v14 }
 0x112   : > { %v692_v26 = vmin.f32 %v660_v49, 6.0  ;;  %v858_v50 = vld [vmem:[#allocation2 + $0x110] sm:$0xff]  ;;  %v1589_v31 = vmul.f32 %v2318_v39, %v2428_v3  ;;  %727 = vst.msk [vmem:[#allocation2 + $0x150] sm:$0xff] %vm364_vm2, %v694_v20  ;;  %v605_v34 = vadd.f32 %v2053_v4, %v2260_v51  ;;  %v596_v35 = vpop.f32.mrb[21].mxu0  ;;  %v794_v37 = vmul.f32 %v2266_v55, %v757_v5 }
 0x113   : > { %v958_v25 = vld [vmem:[#allocation2 + $0x109] sm:$0xff]  ;;  %v2435_v28 = vsel %vm364_vm2, %v1754_v18, 0  ;;  %v895_v38 = vmul.f32 %v2272_v58, %v858_v50  ;;  %v926_v40 = vadd.f32 %v894_v22, %v793_v21  ;;  %v959_v44 = vld [vmem:[#allocation2 + $0x111] sm:$0xff]  ;;  %v597_v46 = vadd.f32 %v2260_v51, %v596_v35  ;;  %v2054_v52 = vpop.f32.mrb[22].mxu0 }
 0x114   : > { %725 = vst.msk [vmem:[#allocation2 + $0x130] sm:$0xff] %vm364_vm2, %v692_v26  ;;  %v995_v53 = vmul.f32 %v2284_v13, %v958_v25  ;;  %v996_v54 = vmul.f32 %v2284_v13, %v959_v44  ;;  %v1620_v62 = vadd.f32 %v1588_v30, %v1519_v19  ;;  %v665_v47 = vmax.f32 %v605_v34, 0.0  ;;  %v599_v0 = vpop.f32.mrb[23].mxu0 }
 0x115   : > { %v608_v63 = vadd.f32 %v2054_v52, %v2260_v51  ;;  %v927_v1 = vadd.f32 %v895_v38, %v794_v37  ;;  %v1621_v48 = vadd.f32 %v1589_v31, %v1520_v24  ;;  %v663_v2 = vmax.f32 %v597_v46, 0.0 }
 0x116   : > { %v600_v6 = vadd.f32 %v2260_v51, %v599_v0  ;;  %v1027_v7 = vadd.f32 %v995_v53, %v926_v40  ;;  %v2452_v8 = vadd.f32 %v2390_v61, %v1620_v62  ;;  %v697_v9 = vmin.f32 %v665_v47, 6.0 }
 0x117   : > { %v666_v10 = vmax.f32 %v608_v63, 0.0  ;;  %v1028_v11 = vadd.f32 %v996_v54, %v927_v1  ;;  %v2455_v15 = vadd.f32 %v2390_v61, %v1621_v48  ;;  %v695_v49 = vmin.f32 %v663_v2, 6.0  ;;  %v2457_v17 = vld [vmem:[#allocation2 + $0x147] sm:$0xff] }
 0x118   : > { %v664_v16 = vmax.f32 %v600_v6, 0.0  ;;  %v2459_v18 = vld [vmem:[#allocation2 + $0x148] sm:$0xff]  ;;  %v2464_v20 = vmul.f32 %v2266_v55, %v2320_v42  ;;  %730 = vst.msk [vmem:[#allocation2 + $0x188] sm:$0xff] %vm364_vm2, %v697_v9  ;;  %v1400_v26 = vmul.f32 %v2303_v32, %v2457_v17  ;;  %v2475_v5 = vmul.f32 %v2297_v29, %v2457_v17 }
 0x119   : > { %v698_v21 = vmin.f32 %v666_v10, 6.0  ;;  %v1059_v22 = vld [vmem:[#allocation2 + $0x127] sm:$0xff]  ;;  %v2471_v4 = vmul.f32 %v2308_v33, %v2459_v18  ;;  %728 = vst.msk [vmem:[#allocation2 + $0x168] sm:$0xff] %vm364_vm2, %v695_v49  ;;  %v2057_v50 = vpop.f32.mrb[24].mxu0  ;;  %v2480_v31 = vld [vmem:[#allocation2 + $0x14f] sm:$0xff] }
 0x11a   : > { %v1160_v24 = vld [vmem:[#allocation2 + $0x128] sm:$0xff]  ;;  %v696_v42 = vmin.f32 %v664_v16, 6.0  ;;  %v1096_v25 = vmul.f32 %v2297_v29, %v1059_v22  ;;  %v2482_v34 = vld [vmem:[#allocation2 + $0x150] sm:$0xff]  ;;  %v795_v37 = vmul.f32 %v2266_v55, %v1059_v22  ;;  %v621_v38 = vadd.f32 %v2057_v50, %v2260_v51  ;;  %v612_v40 = vpop.f32.mrb[25].mxu0 }
 0x11b   : > { %v1197_v30 = vmul.f32 %v2313_v36, %v1160_v24  ;;  %v2484_v35 = vld [vmem:[#allocation2 + $0x149] sm:$0xff]  ;;  %731 = vst.msk [vmem:[#allocation2 + $0x190] sm:$0xff] %vm364_vm2, %v698_v21  ;;  %v1401_v53 = vmul.f32 %v2303_v32, %v2480_v31  ;;  %v1502_v54 = vmul.f32 %v2308_v33, %v2482_v34  ;;  %v613_v47 = vadd.f32 %v2260_v51, %v612_v40  ;;  %v2058_v63 = vpop.f32.mrb[26].mxu0  ;;  %v1262_v2 = vld [vmem:[#allocation2 + $0x131] sm:$0xff] }
 0x11c   : > { %v1060_v44 = vld [vmem:[#allocation2 + $0x12f] sm:$0xff]  ;;  %v1602_v62 = vmul.f32 %v2318_v39, %v2484_v35  ;;  %729 = vst.msk [vmem:[#allocation2 + $0x170] sm:$0xff] %vm364_vm2, %v696_v42  ;;  %v1128_v1 = vadd.f32 %v1096_v25, %v1027_v7  ;;  %v669_v9 = vmax.f32 %v621_v38, 0.0  ;;  %v624_v10 = vadd.f32 %v2058_v63, %v2260_v51  ;;  %v615_v49 = vpop.f32.mrb[27].mxu0 }
 0x11d   : > { %v1161_v46 = vld [vmem:[#allocation2 + $0x130] sm:$0xff]  ;;  %v1097_v0 = vmul.f32 %v2297_v29, %v1060_v44  ;;  %v1299_v21 = vmul.f32 %v2328_v45, %v1262_v2  ;;  %v667_v22 = vmax.f32 %v613_v47, 0.0  ;;  %v616_v42 = vadd.f32 %v2260_v51, %v615_v49 }
 0x11e   : > { %v1261_v52 = vld [vmem:[#allocation2 + $0x129] sm:$0xff]  ;;  %v1198_v48 = vmul.f32 %v2313_v36, %v1161_v46  ;;  %v2499_v6 = vld [vmem:[#allocation2 + $0x151] sm:$0xff]  ;;  %v1229_v40 = vadd.f32 %v1197_v30, %v1128_v1  ;;  %v701_v19 = vmin.f32 %v669_v9, 6.0  ;;  %v670_v7 = vmax.f32 %v624_v10, 0.0 }
 0x11f   : > { %v1298_v16 = vmul.f32 %v2328_v45, %v1261_v52  ;;  %v1129_v50 = vadd.f32 %v1097_v0, %v1028_v11  ;;  %v1603_v25 = vmul.f32 %v2318_v39, %v2499_v6  ;;  %v796_v3 = vmul.f32 %v2266_v55, %v1060_v44 }
 0x120   : > { %v699_v38 = vmin.f32 %v667_v22, 6.0  ;;  %v668_v14 = vmax.f32 %v616_v42, 0.0  ;;  %734 = vst.msk [vmem:[#allocation2 + $0x1c8] sm:$0xff] %vm364_vm2, %v701_v19  ;;  %v702_v41 = vmin.f32 %v670_v7, 6.0  ;;  %v896_v47 = vmul.f32 %v2272_v58, %v1160_v24 }
 0x121   : > { %v1230_v63 = vadd.f32 %v1198_v48, %v1129_v50  ;;  %v1330_v56 = vadd.f32 %v1298_v16, %v1229_v40  ;;  %v897_v49 = vmul.f32 %v2272_v58, %v1161_v46  ;;  %v997_v11 = vmul.f32 %v2284_v13, %v1261_v52  ;;  %v2061_v0 = vpop.f32.mrb[28].mxu0 }
 0x122   : > { %732 = vst.msk [vmem:[#allocation2 + $0x1a8] sm:$0xff] %vm364_vm2, %v699_v38  ;;  %v700_v30 = vmin.f32 %v668_v14, 6.0  ;;  %v998_v44 = vmul.f32 %v2284_v13, %v1262_v2  ;;  %735 = vst.msk [vmem:[#allocation2 + $0x1d0] sm:$0xff] %vm364_vm2, %v702_v41  ;;  %v637_v48 = vadd.f32 %v2061_v0, %v2260_v51  ;;  %v628_v19 = vpop.f32.mrb[29].mxu0  ;;  %v928_v10 = vadd.f32 %v896_v47, %v795_v37 }
 0x123   : > { %v1331_v1 = vadd.f32 %v1299_v21, %v1230_v63  ;;  %v1432_v9 = vadd.f32 %v1400_v26, %v1330_v56  ;;  %v929_v16 = vadd.f32 %v897_v49, %v796_v3  ;;  %v1099_v24 = vmul.f32 %v2297_v29, %v2480_v31  ;;  %v2062_v14 = vpop.f32.mrb[30].mxu0 }
 0x124   : > { %733 = vst.msk [vmem:[#allocation2 + $0x1b0] sm:$0xff] %vm364_vm2, %v700_v30  ;;  %v629_v46 = vadd.f32 %v2260_v51, %v628_v19  ;;  %v1199_v26 = vmul.f32 %v2313_v36, %v2459_v18  ;;  %v673_v41 = vmax.f32 %v637_v48, 0.0  ;;  %v640_v2 = vadd.f32 %v2062_v14, %v2260_v51  ;;  %v631_v21 = vpop.f32.mrb[31].mxu0  ;;  %v2540_v48 = vld [vmem:[#allocation2 + $0x171] sm:$0xff] }
 0x125   : > { %v1433_v52 = vadd.f32 %v1401_v53, %v1331_v1  ;;  %v1533_v56 = vadd.f32 %v2471_v4, %v1432_v9  ;;  %v1029_v37 = vadd.f32 %v997_v11, %v928_v10  ;;  %v1030_v3 = vadd.f32 %v998_v44, %v929_v16  ;;  %v2536_v9 = vld [vmem:[#allocation2 + $0x167] sm:$0xff]  ;;  %v2538_v44 = vld [vmem:[#allocation2 + $0x16f] sm:$0xff] }
 0x126   : > { %v671_v22 = vmax.f32 %v629_v46, 0.0  ;;  %v632_v42 = vadd.f32 %v2260_v51, %v631_v21  ;;  %v705_v7 = vmin.f32 %v673_v41, 6.0  ;;  %v674_v38 = vmax.f32 %v640_v2, 0.0  ;;  %v2547_v46 = vld [vmem:[#allocation2 + $0x168] sm:$0xff]  ;;  %v2549_v14 = vld [vmem:[#allocation2 + $0x170] sm:$0xff] }
 0x127   : > { %v1534_v50 = vadd.f32 %v1502_v54, %v1433_v52  ;;  %v1634_v40 = vadd.f32 %v1602_v62, %v1533_v56  ;;  %v1130_v53 = vadd.f32 %v2475_v5, %v1029_v37  ;;  %v1131_v63 = vadd.f32 %v1099_v24, %v1030_v3  ;;  %v2556_v2 = vld [vmem:[#allocation2 + $0x169] sm:$0xff] }
 0x128   : > { %v703_v4 = vmin.f32 %v671_v22, 6.0  ;;  %v672_v47 = vmax.f32 %v632_v42, 0.0  ;;  %738 = vst.msk [vmem:[#allocation2 + $0x208] sm:$0xff] %vm364_vm2, %v705_v7  ;;  %v706_v0 = vmin.f32 %v674_v38, 6.0  ;;  %v1200_v11 = vmul.f32 %v2313_v36, %v2482_v34 }
 0x129   : > { %v1635_v49 = vadd.f32 %v1603_v25, %v1534_v50  ;;  %v1673_v30 = vadd.f32 %v2390_v61, %v1634_v40  ;;  %v1231_v1 = vadd.f32 %v1199_v26, %v1130_v53  ;;  %v1300_v51 = vmul.f32 %v2328_v45, %v2484_v35 }
 0x12a   : > { %736 = vst.msk [vmem:[#allocation2 + $0x1e8] sm:$0xff] %vm364_vm2, %v703_v4  ;;  %v704_v54 = vmin.f32 %v672_v47, 6.0  ;;  %v1301_v25 = vmul.f32 %v2328_v45, %v2499_v6  ;;  %739 = vst.msk [vmem:[#allocation2 + $0x210] sm:$0xff] %vm364_vm2, %v706_v0  ;;  %v1232_v19 = vadd.f32 %v1200_v11, %v1131_v63  ;;  %v1402_v16 = vmul.f32 %v2303_v32, %v2536_v9 }
 0x12b   : > { %v1674_v5 = vadd.f32 %v2390_v61, %v1635_v49  ;;  %v1705_v62 = vmax.f32 %v1673_v30, 0.0  ;;  %v1332_v10 = vadd.f32 %v1300_v51, %v1231_v1  ;;  %v1403_v24 = vmul.f32 %v2303_v32, %v2538_v44 }
 0x12c   : > { %737 = vst.msk [vmem:[#allocation2 + $0x1f0] sm:$0xff] %vm364_vm2, %v704_v54  ;;  %v1503_v26 = vmul.f32 %v2308_v33, %v2547_v46  ;;  %v1504_v41 = vmul.f32 %v2308_v33, %v2549_v14  ;;  %v1333_v21 = vadd.f32 %v1301_v25, %v1232_v19  ;;  %v1604_v3 = vmul.f32 %v2318_v39, %v2556_v2 }
 0x12d   : > { %v1706_v52 = vmax.f32 %v1674_v5, 0.0  ;;  %v1737_v56 = vmin.f32 %v1705_v62, 6.0  ;;  %v1434_v37 = vadd.f32 %v1402_v16, %v1332_v10  ;;  %v1605_v22 = vmul.f32 %v2318_v39, %v2540_v48  ;;  %v2591_v16 = vld [vmem:[#allocation2 + $0x187] sm:$0xff] }
 0x12e   : > { %v1692_v50 = vmax.f32 %v2455_v15, 0.0  ;;  %v3238_v40 = vmax.f32 %v2452_v8, 0.0  ;;  %v797_v38 = vmul.f32 %v2266_v55, %v2457_v17  ;;  %v1435_v53 = vadd.f32 %v1403_v24, %v1333_v21  ;;  %v2593_v24 = vld [vmem:[#allocation2 + $0x188] sm:$0xff] }
 0x12f   : > { %v1738_v42 = vmin.f32 %v1706_v52, 6.0  ;;  %v1535_v63 = vadd.f32 %v1503_v26, %v1434_v37  ;;  %v798_v4 = vmul.f32 %v2266_v55, %v2480_v31  ;;  %v898_v47 = vmul.f32 %v2272_v58, %v2459_v18  ;;  %v2600_v21 = vld [vmem:[#allocation2 + $0x189] sm:$0xff]  ;;  %v2602_v37 = vld [vmem:[#allocation2 + $0x191] sm:$0xff] }
 0x130   : > { %v1723_v7 = vmin.f32 %v3238_v40, 6.0  ;;  %v1724_v30 = vmin.f32 %v1692_v50, 6.0  ;;  %v899_v0 = vmul.f32 %v2272_v58, %v2482_v34  ;;  %v999_v8 = vmul.f32 %v2284_v13, %v2484_v35  ;;  %v2608_v50 = vld [vmem:[#allocation2 + $0x190] sm:$0xff] }
 0x131   : > { %v1762_v49 = vpack.c.bf16 %v1738_v42, %v1737_v56  ;;  %v1536_v15 = vadd.f32 %v1504_v41, %v1435_v53  ;;  %v1636_v11 = vadd.f32 %v1604_v3, %v1535_v63  ;;  %v930_v1 = vadd.f32 %v898_v47, %v797_v38  ;;  %v2598_v41 = vld [vmem:[#allocation2 + $0x18f] sm:$0xff] }
 0x132   : > { %v1000_v17 = vmul.f32 %v2284_v13, %v2499_v6  ;;  %v1755_v31 = vpack.c.bf16 %v1724_v30, %v1723_v7  ;;  %v931_v51 = vadd.f32 %v899_v0, %v798_v4  ;;  %v1100_v18 = vmul.f32 %v2297_v29, %v2536_v9 }
 0x133   : > { %2064 = vmatprep.subr.msk.bf16.mxu1 %vm364_vm2, %v1762_v49  ;;  %v1101_v54 = vmul.f32 %v2297_v29, %v2538_v44  ;;  %v1637_v34 = vadd.f32 %v1605_v22, %v1536_v15  ;;  %v1675_v35 = vadd.f32 %v2390_v61, %v1636_v11  ;;  %v1031_v5 = vadd.f32 %v999_v8, %v930_v1 }
 0x134   : > { %2012 = vmatpush3.bf16.xpose.msra.mxu1 %v2435_v28  ;;  %v1201_v62 = vmul.f32 %v2313_v36, %v2547_v46  ;;  %v1783_v6 = vsel %vm364_vm2, %v1755_v31, 0  ;;  %v1032_v25 = vadd.f32 %v1000_v17, %v931_v51  ;;  %v1202_v19 = vmul.f32 %v2313_v36, %v2549_v14 }
 0x135   : > { %v1302_v10 = vmul.f32 %v2328_v45, %v2556_v2  ;;  %v1676_v28 = vadd.f32 %v2390_v61, %v1637_v34  ;;  %v1707_v52 = vmax.f32 %v1675_v35, 0.0  ;;  %v1132_v56 = vadd.f32 %v1100_v18, %v1031_v5  ;;  %v2631_v35 = vld [vmem:[#allocation2 + $0x87] sm:$0xff] }
 0x136   : > { %v1303_v26 = vmul.f32 %v2328_v45, %v2540_v48  ;;  %v1133_v3 = vadd.f32 %v1101_v54, %v1032_v25  ;;  %v1404_v22 = vmul.f32 %v2303_v32, %v2591_v16  ;;  %v1405_v42 = vmul.f32 %v2303_v32, %v2598_v41 }
 0x137   : > { %v1505_v40 = vmul.f32 %v2308_v33, %v2593_v24  ;;  %v1708_v7 = vmax.f32 %v1676_v28, 0.0  ;;  %v1739_v38 = vmin.f32 %v1707_v52, 6.0  ;;  %v1233_v53 = vadd.f32 %v1201_v62, %v1132_v56  ;;  %v3241_v56 = vld [vmem:[#allocation5_spill] sm:$0xff] }
 0x138   : > { %v1506_v63 = vmul.f32 %v2308_v33, %v2608_v50  ;;  %v1234_v4 = vadd.f32 %v1202_v19, %v1133_v3  ;;  %v1606_v47 = vmul.f32 %v2318_v39, %v2600_v21  ;;  %v1607_v49 = vmul.f32 %v2318_v39, %v2602_v37  ;;  %v2641_v19 = vld [vmem:[#allocation2 + $0x88] sm:$0xff]  ;;  %v2649_v3 = vld [vmem:[#allocation2 + $0x90] sm:$0xff] }
 0x139   : > { %v782_v30 = vmul.f32 %v2266_v55, %v2343_v57  ;;  %v1740_v0 = vmin.f32 %v1708_v7, 6.0  ;;  %v1334_v8 = vadd.f32 %v1302_v10, %v1233_v53  ;;  %v882_v15 = vmul.f32 %v2272_v58, %v2322_v43  ;;  %v2633_v43 = vld [vmem:[#allocation2 + $0x8f] sm:$0xff] }
 0x13a   : > { %v883_v11 = vmul.f32 %v2272_v58, %v2345_v59  ;;  %v1335_v1 = vadd.f32 %v1303_v26, %v1234_v4  ;;  %v983_v17 = vmul.f32 %v2284_v13, %v2347_v60  ;;  %v984_v31 = vmul.f32 %v2284_v13, %v2362_v12  ;;  %v3239_v60 = vld [vmem:[#allocation3_spill] sm:$0xff]  ;;  %v3240_v12 = vld [vmem:[#allocation4_spill] sm:$0xff] }
 0x13b   : > { %v1084_v51 = vmul.f32 %v2297_v29, %v2395_v23  ;;  %v1763_v18 = vpack.c.bf16 %v1740_v0, %v1739_v38  ;;  %v1436_v57 = vadd.f32 %v1404_v22, %v1334_v8  ;;  %v914_v54 = vadd.f32 %v882_v15, %v2464_v20  ;;  %v1753_v20 = vld [vmem:[%s3223_s6] sm:$0x3]  ;;  %v2651_v22 = vld [vmem:[#allocation2 + $0x89] sm:$0xff]  ;;  %v3242_v38 = vld [vmem:[#allocation6_spill] sm:$0xff] }
 0x13c   : > { %v915_v34 = vadd.f32 %v883_v11, %v782_v30  ;;  %v1437_v59 = vadd.f32 %v1405_v42, %v1335_v1  ;;  %v1085_v5 = vmul.f32 %v2297_v29, %v2402_v27  ;;  %v1185_v62 = vmul.f32 %v2313_v36, %v3239_v60  ;;  %v2653_v42 = vld [vmem:[#allocation2 + $0x91] sm:$0xff]  ;;  %2027 = vmatprep.mubr.msk.bf16.mxu1 %vm364_vm2, %v1753_v20 }
 0x13d   : > { %v1186_v25 = vmul.f32 %v2313_v36, %v3240_v12  ;;  %2065 = vmatprep.subr.msk.bf16.mxu1 %vm364_vm2, %v1763_v18  ;;  %v1537_v10 = vadd.f32 %v1505_v40, %v1436_v57  ;;  %v1015_v28 = vadd.f32 %v983_v17, %v914_v54  ;;  %v1286_v26 = vmul.f32 %v2328_v45, %v3241_v56 }
 0x13e   : > { %v1016_v52 = vadd.f32 %v984_v31, %v915_v34  ;;  %2014 = vmatpush3.bf16.xpose.msra.mxu1 %v1783_v6  ;;  %v1538_v7 = vadd.f32 %v1506_v63, %v1437_v59  ;;  %v1287_v53 = vmul.f32 %v2328_v45, %v3242_v38  ;;  %v1388_v4 = vmul.f32 %v2303_v32, %v2631_v35 }
 0x13f   : > { %v1389_v40 = vmul.f32 %v2303_v32, %v2633_v43  ;;  %v1638_v30 = vadd.f32 %v1606_v47, %v1537_v10  ;;  %v1116_v0 = vadd.f32 %v1084_v51, %v1015_v28  ;;  %v1489_v15 = vmul.f32 %v2308_v33, %v2641_v19 }
 0x140   : > { %v1117_v8 = vadd.f32 %v1085_v5, %v1016_v52  ;;  %v1639_v11 = vadd.f32 %v1607_v49, %v1538_v7  ;;  %v1490_v6 = vmul.f32 %v2308_v33, %v2649_v3  ;;  %v1590_v63 = vmul.f32 %v2318_v39, %v2651_v22 }
 0x141   : > { %v1591_v1 = vmul.f32 %v2318_v39, %v2653_v42  ;;  %v1677_v17 = vadd.f32 %v2390_v61, %v1638_v30  ;;  %v1217_v47 = vadd.f32 %v1185_v62, %v1116_v0  ;;  %v799_v51 = vmul.f32 %v2266_v55, %v2536_v9 }
 0x142   : > { %v1218_v31 = vadd.f32 %v1186_v25, %v1117_v8  ;;  %v1678_v18 = vadd.f32 %v2390_v61, %v1639_v11  ;;  %v800_v49 = vmul.f32 %v2266_v55, %v2538_v44  ;;  %v900_v57 = vmul.f32 %v2272_v58, %v2547_v46  ;;  %v2694_v11 = vld [vmem:[#allocation2 + $0x1a7] sm:$0xff] }
 0x143   : > { %v901_v54 = vmul.f32 %v2272_v58, %v2549_v14  ;;  %v1709_v34 = vmax.f32 %v1677_v17, 0.0  ;;  %v1318_v59 = vadd.f32 %v1286_v26, %v1217_v47  ;;  %v1001_v62 = vmul.f32 %v2284_v13, %v2556_v2 }
 0x144   : > { %v1319_v5 = vadd.f32 %v1287_v53, %v1218_v31  ;;  %v1710_v25 = vmax.f32 %v1678_v18, 0.0  ;;  %v932_v20 = vadd.f32 %v900_v57, %v799_v51  ;;  %v1002_v10 = vmul.f32 %v2284_v13, %v2540_v48  ;;  %v2702_v51 = vld [vmem:[#allocation2 + $0x1a8] sm:$0xff] }
 0x145   : > { %v933_v9 = vadd.f32 %v901_v54, %v800_v49  ;;  %v1741_v28 = vmin.f32 %v1709_v34, 6.0  ;;  %v1420_v44 = vadd.f32 %v1388_v4, %v1318_v59  ;;  %v1102_v46 = vmul.f32 %v2297_v29, %v2591_v16  ;;  %v2707_v54 = vld [vmem:[#allocation2 + $0x1b0] sm:$0xff] }
 0x146   : > { %v1421_v52 = vadd.f32 %v1389_v40, %v1319_v5  ;;  %v1742_v7 = vmin.f32 %v1710_v25, 6.0  ;;  %v1033_v58 = vadd.f32 %v1001_v62, %v932_v20  ;;  %v1103_v26 = vmul.f32 %v2297_v29, %v2598_v41  ;;  %v2717_v62 = vld [vmem:[#allocation2 + $0x1b1] sm:$0xff] }
 0x147   : > { %v1034_v14 = vadd.f32 %v1002_v10, %v933_v9  ;;  %v1521_v53 = vadd.f32 %v1489_v15, %v1420_v44  ;;  %v1203_v30 = vmul.f32 %v2313_v36, %v2593_v24  ;;  %v1204_v48 = vmul.f32 %v2313_v36, %v2608_v50 }
 0x148   : > { %v1522_v2 = vadd.f32 %v1490_v6, %v1421_v52  ;;  %v1764_v0 = vpack.c.bf16 %v1742_v7, %v1741_v28  ;;  %v1134_v4 = vadd.f32 %v1102_v46, %v1033_v58  ;;  %v1304_v8 = vmul.f32 %v2328_v45, %v2600_v21  ;;  %v2698_v6 = vld [vmem:[#allocation2 + $0x1af] sm:$0xff]  ;;  %v2728_v46 = vld [vmem:[%s3221_s4] ss:$0 sm:$0xff]  ;;  %v2735_v58 = vld [vmem:[%s3221_s4 + $0x1] ss:$0 sm:$0xff] }
 0x149   : > { %v1135_v40 = vadd.f32 %v1103_v26, %v1034_v14  ;;  %v1622_v17 = vadd.f32 %v1590_v63, %v1521_v53  ;;  %v1305_v15 = vmul.f32 %v2328_v45, %v2602_v37  ;;  %v1406_v31 = vmul.f32 %v2303_v32, %v2694_v11 }
 0x14a   : > { %v1623_v47 = vadd.f32 %v1591_v1, %v1522_v2  ;;  %2066 = vmatprep.subr.msk.bf16.mxu1 %vm364_vm2, %v1764_v0  ;;  %v1235_v18 = vadd.f32 %v1203_v30, %v1134_v4  ;;  %v1407_v57 = vmul.f32 %v2303_v32, %v2698_v6  ;;  %v1507_v63 = vmul.f32 %v2308_v33, %v2702_v51  ;;  %v2711_v1 = vld [vmem:[#allocation2 + $0x1a9] sm:$0xff] }
 0x14b   : > { %v1236_v49 = vadd.f32 %v1204_v48, %v1135_v40  ;;  %v1661_v34 = vadd.f32 %v2390_v61, %v1622_v17  ;;  %v1508_v5 = vmul.f32 %v2308_v33, %v2707_v54  ;;  %v1608_v25 = vmul.f32 %v2318_v39, %v2711_v1 }
 0x14c   : > { %v1662_v59 = vadd.f32 %v2390_v61, %v1623_v47  ;;  %v1336_v20 = vadd.f32 %v1304_v8, %v1235_v18  ;;  %v1609_v10 = vmul.f32 %v2318_v39, %v2717_v62  ;;  %v783_v28 = vmul.f32 %v2266_v55, %v2395_v23  ;;  %v2751_v47 = vld [vmem:[#allocation2 + $0xa7] sm:$0xff] }
 0x14d   : > { %v1337_v9 = vadd.f32 %v1305_v15, %v1236_v49  ;;  %v1693_v44 = vmax.f32 %v1661_v34, 0.0  ;;  %v784_v7 = vmul.f32 %v2728_v46, %v2402_v27  ;;  %v884_v14 = vmul.f32 %v2735_v58, %v3239_v60  ;;  %v2757_v49 = vld [vmem:[#allocation2 + $0xa8] sm:$0xff] }
 0x14e   : > { %v1694_v52 = vmax.f32 %v1662_v59, 0.0  ;;  %v1438_v26 = vadd.f32 %v1406_v31, %v1336_v20  ;;  %v885_v23 = vmul.f32 %v2735_v58, %v3240_v12  ;;  %v985_v53 = vmul.f32 %v2284_v13, %v3241_v56 }
 0x14f   : > { %v1439_v55 = vadd.f32 %v1407_v57, %v1337_v9  ;;  %v1725_v2 = vmin.f32 %v1693_v44, 6.0  ;;  %v916_v48 = vadd.f32 %v884_v14, %v783_v28  ;;  %v986_v27 = vmul.f32 %v2284_v13, %v3242_v38  ;;  %v2755_v38 = vld [vmem:[#allocation2 + $0xaf] sm:$0xff] }
 0x150   : > { %v1726_v30 = vmin.f32 %v1694_v52, 6.0  ;;  %v1539_v0 = vadd.f32 %v1507_v63, %v1438_v26  ;;  %v917_v40 = vadd.f32 %v885_v23, %v784_v7  ;;  %v1086_v60 = vmul.f32 %v2297_v29, %v2631_v35  ;;  %v2759_v57 = vld [vmem:[#allocation2 + $0xb0] sm:$0xff] }
 0x151   : > { %v1540_v4 = vadd.f32 %v1508_v5, %v1439_v55  ;;  %v1017_v17 = vadd.f32 %v985_v53, %v916_v48  ;;  %v1087_v12 = vmul.f32 %v2297_v29, %v2633_v43  ;;  %v1187_v56 = vmul.f32 %v2313_v36, %v2641_v19  ;;  %v2766_v5 = vld [vmem:[#allocation2 + $0xa9] sm:$0xff] }
 0x152   : > { %v1756_v8 = vpack.c.bf16 %v1726_v30, %v1725_v2  ;;  %v1640_v15 = vadd.f32 %v1608_v25, %v1539_v0  ;;  %v1018_v18 = vadd.f32 %v986_v27, %v917_v40  ;;  %v1188_v13 = vmul.f32 %v2313_v36, %v2649_v3 }
 0x153   : > { %v1641_v31 = vadd.f32 %v1609_v10, %v1540_v4  ;;  %v1118_v29 = vadd.f32 %v1086_v60, %v1017_v17  ;;  %v1288_v34 = vmul.f32 %v2328_v45, %v2651_v22  ;;  %v1289_v59 = vmul.f32 %v2328_v45, %v2653_v42  ;;  %v2772_v10 = vld [vmem:[#allocation2 + $0xb1] sm:$0xff]  ;;  %v2808_v17 = vld [vmem:[#allocation2 + $0x1c7] sm:$0xff] }
 0x154   : > { %v1786_v63 = vsel %vm364_vm2, %v1756_v8, 0  ;;  %v1679_v36 = vadd.f32 %v2390_v61, %v1640_v15  ;;  %v1119_v20 = vadd.f32 %v1087_v12, %v1018_v18  ;;  %v1390_v9 = vmul.f32 %v2303_v32, %v2751_v47  ;;  %v2821_v18 = vld [vmem:[#allocation2 + $0x1c8] sm:$0xff] }
 0x155   : > { %2016 = vmatpush3.bf16.xpose.msra.mxu1 %v1786_v63  ;;  %v1680_v25 = vadd.f32 %v2390_v61, %v1641_v31  ;;  %v1219_v28 = vadd.f32 %v1187_v56, %v1118_v29  ;;  %v1391_v44 = vmul.f32 %v2303_v32, %v2755_v38  ;;  %v1491_v45 = vmul.f32 %v2308_v33, %v2757_v49  ;;  %v2819_v31 = vld [vmem:[#allocation2 + $0x1cf] sm:$0xff] }
 0x156   : > { %v1492_v52 = vmul.f32 %v2308_v33, %v2759_v57  ;;  %v1711_v7 = vmax.f32 %v1679_v36, 0.0  ;;  %v1220_v26 = vadd.f32 %v1188_v13, %v1119_v20  ;;  %v1592_v55 = vmul.f32 %v2318_v39, %v2766_v5  ;;  %v2833_v36 = vld [vmem:[#allocation2 + $0x1d0] sm:$0xff] }
 0x157   : > { %v1712_v14 = vmax.f32 %v1680_v25, 0.0  ;;  %v1320_v23 = vadd.f32 %v1288_v34, %v1219_v28  ;;  %v1593_v53 = vmul.f32 %v2318_v39, %v2772_v10  ;;  %v801_v2 = vmul.f32 %v2728_v46, %v2591_v16  ;;  %v2795_v39 = vld [vmem:[%s3221_s4 + $0x2] ss:$0 sm:$0xff]  ;;  %v2829_v34 = vld [vmem:[%s3221_s4 + $0x5] ss:$0 sm:$0xff]  ;;  %v2835_v25 = vld [vmem:[#allocation2 + $0x1c9] sm:$0xff] }
 0x158   : > { %v802_v32 = vmul.f32 %v2728_v46, %v2598_v41  ;;  %v1743_v30 = vmin.f32 %v1711_v7, 6.0  ;;  %v1321_v27 = vadd.f32 %v1289_v59, %v1220_v26  ;;  %v902_v33 = vmul.f32 %v2735_v58, %v2593_v24  ;;  %v2804_v24 = vld [vmem:[%s3221_s4 + $0x3] ss:$0 sm:$0xff] }
 0x159   : > { %v1744_v48 = vmin.f32 %v1712_v14, 6.0  ;;  %v1422_v0 = vadd.f32 %v1390_v9, %v1320_v23  ;;  %v903_v4 = vmul.f32 %v2735_v58, %v2608_v50  ;;  %v1003_v16 = vmul.f32 %v2795_v39, %v2600_v21 }
 0x15a   : > { %v1004_v41 = vmul.f32 %v2795_v39, %v2602_v37  ;;  %v1423_v60 = vadd.f32 %v1391_v44, %v1321_v27  ;;  %v934_v8 = vadd.f32 %v902_v33, %v801_v2  ;;  %v1104_v50 = vmul.f32 %v2804_v24, %v2694_v11  ;;  %v2815_v37 = vld [vmem:[%s3221_s4 + $0x4] ss:$0 sm:$0xff]  ;;  %v2842_v44 = vld [vmem:[%s3221_s4 + $0x6] ss:$0 sm:$0xff] }
 0x15b   : > { %v1765_v40 = vpack.c.bf16 %v1744_v48, %v1743_v30  ;;  %v1523_v12 = vadd.f32 %v1491_v45, %v1422_v0  ;;  %v935_v56 = vadd.f32 %v903_v4, %v802_v32  ;;  %v1105_v21 = vmul.f32 %v2804_v24, %v2698_v6 }
 0x15c   : > { %v1205_v15 = vmul.f32 %v2815_v37, %v2702_v51  ;;  %v1524_v13 = vadd.f32 %v1492_v52, %v1423_v60  ;;  %v1035_v63 = vadd.f32 %v1003_v16, %v934_v8  ;;  %v1206_v29 = vmul.f32 %v2815_v37, %v2707_v54  ;;  %v2846_v52 = vld [vmem:[#allocation2 + $0x1d1] sm:$0xff] }
 0x15d   : > { %2067 = vmatprep.subr.msk.bf16.mxu1 %vm364_vm2, %v1765_v40  ;;  %v1306_v59 = vmul.f32 %v2829_v34, %v2711_v1  ;;  %v1624_v20 = vadd.f32 %v1592_v55, %v1523_v12  ;;  %v1036_v9 = vadd.f32 %v1004_v41, %v935_v56  ;;  %v1307_v28 = vmul.f32 %v2829_v34, %v2717_v62  ;;  %v2853_v55 = vld [vmem:[%s3221_s4 + $0x7] ss:$0 sm:$0xff] }
 0x15e   : > { %v1408_v45 = vmul.f32 %v2842_v44, %v2808_v17  ;;  %v1625_v7 = vadd.f32 %v1593_v53, %v1524_v13  ;;  %v1136_v14 = vadd.f32 %v1104_v50, %v1035_v63  ;;  %v1409_v26 = vmul.f32 %v2842_v44, %v2819_v31  ;;  %v2863_v53 = vld [vmem:[%s3221_s4 + $0x8] ss:$0 sm:$0xff] }
 0x15f   : > { %v1509_v23 = vmul.f32 %v2853_v55, %v2821_v18  ;;  %v1663_v2 = vadd.f32 %v2390_v61, %v1624_v20  ;;  %v1137_v32 = vadd.f32 %v1105_v21, %v1036_v9  ;;  %v1510_v30 = vmul.f32 %v2853_v55, %v2833_v36  ;;  %v2888_v20 = vld [vmem:[#allocation2 + $0xc7] sm:$0xff] }
 0x160   : > { %v1610_v48 = vmul.f32 %v2863_v53, %v2835_v25  ;;  %v1664_v27 = vadd.f32 %v2390_v61, %v1625_v7  ;;  %v1237_v33 = vadd.f32 %v1205_v15, %v1136_v14  ;;  %v1611_v0 = vmul.f32 %v2863_v53, %v2846_v52  ;;  %v2894_v14 = vld [vmem:[#allocation2 + $0xc8] sm:$0xff] }
 0x161   : > { %v785_v4 = vmul.f32 %v2728_v46, %v2631_v35  ;;  %v1695_v16 = vmax.f32 %v1663_v2, 0.0  ;;  %v1238_v41 = vadd.f32 %v1206_v29, %v1137_v32  ;;  %v786_v40 = vmul.f32 %v2728_v46, %v2633_v43 }
 0x162   : > { %v886_v60 = vmul.f32 %v2735_v58, %v2641_v19  ;;  %v1696_v8 = vmax.f32 %v1664_v27, 0.0  ;;  %v1338_v50 = vadd.f32 %v1306_v59, %v1237_v33  ;;  %v887_v61 = vmul.f32 %v2735_v58, %v2649_v3  ;;  %v2900_v33 = vld [vmem:[#allocation2 + $0xd0] sm:$0xff] }
 0x163   : > { %v987_v12 = vmul.f32 %v2795_v39, %v2651_v22  ;;  %v1727_v56 = vmin.f32 %v1695_v16, 6.0  ;;  %v1339_v21 = vadd.f32 %v1307_v28, %v1238_v41  ;;  %v988_v35 = vmul.f32 %v2795_v39, %v2653_v42 }
 0x164   : > { %v918_v15 = vadd.f32 %v886_v60, %v785_v4  ;;  %v1728_v13 = vmin.f32 %v1696_v8, 6.0  ;;  %v1440_v63 = vadd.f32 %v1408_v45, %v1338_v50  ;;  %v919_v43 = vadd.f32 %v887_v61, %v786_v40  ;;  %v2892_v45 = vld [vmem:[#allocation2 + $0xcf] sm:$0xff] }
 0x165   : > { %v1088_v19 = vmul.f32 %v2804_v24, %v2751_v47  ;;  %v1441_v29 = vadd.f32 %v1409_v26, %v1339_v21  ;;  %v1089_v3 = vmul.f32 %v2804_v24, %v2755_v38  ;;  %v1189_v22 = vmul.f32 %v2815_v37, %v2757_v49  ;;  %v2902_v4 = vld [vmem:[#allocation2 + $0xc9] sm:$0xff]  ;;  %v2907_v60 = vld [vmem:[#allocation2 + $0xd1] sm:$0xff] }
 0x166   : > { %v1019_v59 = vadd.f32 %v987_v12, %v918_v15  ;;  %v1757_v9 = vpack.c.bf16 %v1728_v13, %v1727_v56  ;;  %v1541_v28 = vadd.f32 %v1509_v23, %v1440_v63  ;;  %v1020_v7 = vadd.f32 %v988_v35, %v919_v43  ;;  %v2916_v12 = vld [vmem:[%s3222_s5] ss:$0 sm:$0xff] }
 0x167   : > { %v1190_v42 = vmul.f32 %v2815_v37, %v2759_v57  ;;  %v1542_v26 = vadd.f32 %v1510_v30, %v1441_v29  ;;  %v1290_v32 = vmul.f32 %v2829_v34, %v2766_v5  ;;  %v1291_v27 = vmul.f32 %v2829_v34, %v2772_v10 }
 0x168   : > { %v1120_v2 = vadd.f32 %v1088_v19, %v1019_v59  ;;  %v1789_v23 = vsel %vm364_vm2, %v1757_v9, 0  ;;  %v1642_v16 = vadd.f32 %v1610_v48, %v1541_v28  ;;  %v1121_v41 = vadd.f32 %v1089_v3, %v1020_v7 }
 0x169   : > { %v1392_v40 = vmul.f32 %v2842_v44, %v2888_v20  ;;  %2018 = vmatpush3.bf16.xpose.msra.mxu1 %v1789_v23  ;;  %v1643_v30 = vadd.f32 %v1611_v0, %v1542_v26  ;;  %v1393_v50 = vmul.f32 %v2842_v44, %v2892_v45  ;;  %v1493_v61 = vmul.f32 %v2853_v55, %v2894_v14 }
 0x16a   : > { %v1221_v8 = vadd.f32 %v1189_v22, %v1120_v2  ;;  %v1681_v48 = vadd.f32 %v2916_v12, %v1642_v16  ;;  %v1222_v56 = vadd.f32 %v1190_v42, %v1121_v41  ;;  %v1494_v21 = vmul.f32 %v2853_v55, %v2900_v33  ;;  %v2944_v16 = vld [vmem:[#allocation2 + $0x1e7] sm:$0xff]  ;;  %v2946_v41 = vld [vmem:[#allocation2 + $0x1ef] sm:$0xff] }
 0x16b   : > { %v1594_v0 = vmul.f32 %v2863_v53, %v2902_v4  ;;  %v1682_v15 = vadd.f32 %v2916_v12, %v1643_v30  ;;  %v1595_v13 = vmul.f32 %v2863_v53, %v2907_v60  ;;  %v803_v63 = vmul.f32 %v2728_v46, %v2694_v11 }
 0x16c   : > { %v1322_v35 = vadd.f32 %v1290_v32, %v1221_v8  ;;  %v1713_v43 = vmax.f32 %v1681_v48, 0.0  ;;  %v1323_v19 = vadd.f32 %v1291_v27, %v1222_v56  ;;  %v804_v29 = vmul.f32 %v2728_v46, %v2698_v6 }
 0x16d   : > { %v904_v59 = vmul.f32 %v2735_v58, %v2702_v51  ;;  %v1714_v3 = vmax.f32 %v1682_v15, 0.0  ;;  %v905_v9 = vmul.f32 %v2735_v58, %v2707_v54  ;;  %v1005_v28 = vmul.f32 %v2795_v39, %v2711_v1 }
 0x16e   : > { %v1424_v22 = vadd.f32 %v1392_v40, %v1322_v35  ;;  %v1745_v7 = vmin.f32 %v1713_v43, 6.0  ;;  %v1425_v42 = vadd.f32 %v1393_v50, %v1323_v19  ;;  %v1006_v11 = vmul.f32 %v2795_v39, %v2717_v62  ;;  %v2950_v50 = vld [vmem:[#allocation2 + $0x1e8] sm:$0xff] }
 0x16f   : > { %v936_v26 = vadd.f32 %v904_v59, %v803_v63  ;;  %v1746_v2 = vmin.f32 %v1714_v3, 6.0  ;;  %v937_v6 = vadd.f32 %v905_v9, %v804_v29  ;;  %v1106_v51 = vmul.f32 %v2804_v24, %v2808_v17  ;;  %v2958_v35 = vld [vmem:[#allocation2 + $0x1e9] sm:$0xff]  ;;  %v2960_v63 = vld [vmem:[#allocation2 + $0x1f1] sm:$0xff] }
 0x170   : > { %v1525_v32 = vadd.f32 %v1493_v61, %v1424_v22  ;;  %v1526_v27 = vadd.f32 %v1494_v21, %v1425_v42  ;;  %v1107_v54 = vmul.f32 %v2804_v24, %v2819_v31  ;;  %v1207_v1 = vmul.f32 %v2815_v37, %v2821_v18  ;;  %v2952_v61 = vld [vmem:[#allocation2 + $0x1f0] sm:$0xff] }
 0x171   : > { %v1037_v23 = vadd.f32 %v1005_v28, %v936_v26  ;;  %v1766_v40 = vpack.c.bf16 %v1746_v2, %v1745_v7  ;;  %v1038_v30 = vadd.f32 %v1006_v11, %v937_v6  ;;  %v1208_v8 = vmul.f32 %v2815_v37, %v2833_v36 }
 0x172   : > { %v1626_v62 = vadd.f32 %v1594_v0, %v1525_v32  ;;  %v1627_v48 = vadd.f32 %v1595_v13, %v1526_v27  ;;  %v1308_v21 = vmul.f32 %v2829_v34, %v2835_v25  ;;  %v1309_v15 = vmul.f32 %v2829_v34, %v2846_v52 }
 0x173   : > { %v1138_v56 = vadd.f32 %v1106_v51, %v1037_v23  ;;  %2068 = vmatprep.subr.msk.bf16.mxu1 %vm364_vm2, %v1766_v40  ;;  %v1139_v43 = vadd.f32 %v1107_v54, %v1038_v30  ;;  %v1410_v19 = vmul.f32 %v2842_v44, %v2944_v16  ;;  %v1411_v13 = vmul.f32 %v2842_v44, %v2946_v41 }
 0x174   : > { %v1665_v0 = vadd.f32 %v2916_v12, %v1626_v62  ;;  %v1666_v29 = vadd.f32 %v2916_v12, %v1627_v48  ;;  %v1511_v3 = vmul.f32 %v2853_v55, %v2950_v50  ;;  %v1512_v22 = vmul.f32 %v2853_v55, %v2952_v61 }
 0x175   : > { %v1239_v59 = vadd.f32 %v1207_v1, %v1138_v56  ;;  %v1240_v28 = vadd.f32 %v1208_v8, %v1139_v43  ;;  %v1612_v7 = vmul.f32 %v2863_v53, %v2958_v35  ;;  %v1613_v42 = vmul.f32 %v2863_v53, %v2960_v63  ;;  %v2999_v43 = vld [vmem:[#allocation2 + $0xef] sm:$0xff] }
 0x176   : > { %v1697_v9 = vmax.f32 %v1665_v0, 0.0  ;;  %v1698_v26 = vmax.f32 %v1666_v29, 0.0  ;;  %v787_v2 = vmul.f32 %v2728_v46, %v2751_v47  ;;  %v788_v32 = vmul.f32 %v2728_v46, %v2755_v38 }
 0x177   : > { %v1340_v11 = vadd.f32 %v1308_v21, %v1239_v59  ;;  %v1341_v51 = vadd.f32 %v1309_v15, %v1240_v28  ;;  %v888_v27 = vmul.f32 %v2735_v58, %v2757_v49  ;;  %v889_v23 = vmul.f32 %v2735_v58, %v2759_v57  ;;  %v2995_v21 = vld [vmem:[#allocation2 + $0xe7] sm:$0xff] }
 0x178   : > { %v1729_v6 = vmin.f32 %v1697_v9, 6.0  ;;  %v1730_v54 = vmin.f32 %v1698_v26, 6.0  ;;  %v989_v40 = vmul.f32 %v2795_v39, %v2766_v5  ;;  %v990_v62 = vmul.f32 %v2795_v39, %v2772_v10  ;;  %v3010_v9 = vld [vmem:[#allocation2 + $0xe9] sm:$0xff] }
 0x179   : > { %v1442_v1 = vadd.f32 %v1410_v19, %v1340_v11  ;;  %v1443_v47 = vadd.f32 %v1411_v13, %v1341_v51  ;;  %v920_v30 = vadd.f32 %v888_v27, %v787_v2  ;;  %v921_v8 = vadd.f32 %v889_v23, %v788_v32  ;;  %v3001_v19 = vld [vmem:[#allocation2 + $0xe8] sm:$0xff]  ;;  %v3003_v13 = vld [vmem:[#allocation2 + $0xf0] sm:$0xff] }
 0x17a   : > { %v1090_v38 = vmul.f32 %v2804_v24, %v2888_v20  ;;  %v1758_v48 = vpack.c.bf16 %v1730_v54, %v1729_v6  ;;  %v1091_v49 = vmul.f32 %v2804_v24, %v2892_v45  ;;  %v1191_v57 = vmul.f32 %v2815_v37, %v2894_v14  ;;  %v3014_v32 = vld [vmem:[#allocation2 + $0xf1] sm:$0xff] }
 0x17b   : > { %v1543_v56 = vadd.f32 %v1511_v3, %v1442_v1  ;;  %v1544_v5 = vadd.f32 %v1512_v22, %v1443_v47  ;;  %v1021_v15 = vadd.f32 %v989_v40, %v920_v30  ;;  %v1022_v0 = vadd.f32 %v990_v62, %v921_v8 }
 0x17c   : > { %v1192_v10 = vmul.f32 %v2815_v37, %v2900_v33  ;;  %v1792_v29 = vsel %vm364_vm2, %v1758_v48, 0  ;;  %v1292_v3 = vmul.f32 %v2829_v34, %v2902_v4  ;;  %v1293_v22 = vmul.f32 %v2829_v34, %v2907_v60 }
 0x17d   : > { %v1644_v59 = vadd.f32 %v1612_v7, %v1543_v56  ;;  %2020 = vmatpush3.bf16.xpose.msra.mxu1 %v1792_v29  ;;  %v1645_v28 = vadd.f32 %v1613_v42, %v1544_v5  ;;  %v1122_v26 = vadd.f32 %v1090_v38, %v1021_v15  ;;  %v1123_v11 = vadd.f32 %v1091_v49, %v1022_v0 }
 0x17e   : > { %v1394_v2 = vmul.f32 %v2842_v44, %v2995_v21  ;;  %v1395_v7 = vmul.f32 %v2842_v44, %v2999_v43  ;;  %v1495_v51 = vmul.f32 %v2853_v55, %v3001_v19  ;;  %v1496_v27 = vmul.f32 %v2853_v55, %v3003_v13 }
 0x17f   : > { %v1683_v6 = vadd.f32 %v2916_v12, %v1644_v59  ;;  %v1684_v42 = vadd.f32 %v2916_v12, %v1645_v28  ;;  %v1223_v23 = vadd.f32 %v1191_v57, %v1122_v26  ;;  %v1224_v54 = vadd.f32 %v1192_v10, %v1123_v11  ;;  %v3048_v26 = vld [vmem:[#allocation2 + $0x20f] sm:$0xff] }
 0x180   : > { %v1596_v1 = vmul.f32 %v2863_v53, %v3010_v9  ;;  %v1597_v62 = vmul.f32 %v2863_v53, %v3014_v32  ;;  %v805_v47 = vmul.f32 %v2728_v46, %v2808_v17  ;;  %v806_v30 = vmul.f32 %v2728_v46, %v2819_v31  ;;  %v3050_v11 = vld [vmem:[#allocation2 + $0x208] sm:$0xff] }
 0x181   : > { %v1715_v40 = vmax.f32 %v1683_v6, 0.0  ;;  %v1716_v8 = vmax.f32 %v1684_v42, 0.0  ;;  %v1324_v38 = vadd.f32 %v1292_v3, %v1223_v23  ;;  %v1325_v48 = vadd.f32 %v1293_v22, %v1224_v54  ;;  %v3046_v3 = vld [vmem:[#allocation2 + $0x207] sm:$0xff] }
 0x182   : > { %v906_v56 = vmul.f32 %v2735_v58, %v2821_v18  ;;  %v907_v57 = vmul.f32 %v2735_v58, %v2833_v36  ;;  %v1007_v5 = vmul.f32 %v2795_v39, %v2835_v25  ;;  %v1008_v15 = vmul.f32 %v2795_v39, %v2846_v52  ;;  %v3060_v54 = vld [vmem:[#allocation2 + $0x209] sm:$0xff] }
 0x183   : > { %v1747_v49 = vmin.f32 %v1715_v40, 6.0  ;;  %v1748_v17 = vmin.f32 %v1716_v8, 6.0  ;;  %v1426_v0 = vadd.f32 %v1394_v2, %v1324_v38  ;;  %v1427_v10 = vadd.f32 %v1395_v7, %v1325_v48  ;;  %v3052_v2 = vld [vmem:[#allocation2 + $0x210] sm:$0xff] }
 0x184   : > { %v938_v31 = vadd.f32 %v906_v56, %v805_v47  ;;  %v939_v29 = vadd.f32 %v907_v57, %v806_v30  ;;  %v1108_v59 = vmul.f32 %v2804_v24, %v2944_v16  ;;  %v1109_v18 = vmul.f32 %v2804_v24, %v2946_v41  ;;  %v3065_v30 = vld [vmem:[#allocation2 + $0x211] sm:$0xff] }
 0x185   : > { %v1209_v36 = vmul.f32 %v2815_v37, %v2950_v50  ;;  %v1767_v25 = vpack.c.bf16 %v1748_v17, %v1747_v49  ;;  %v1527_v22 = vadd.f32 %v1495_v51, %v1426_v0  ;;  %v1528_v28 = vadd.f32 %v1496_v27, %v1427_v10 }
 0x186   : > { %v1039_v52 = vadd.f32 %v1007_v5, %v938_v31  ;;  %v1040_v6 = vadd.f32 %v1008_v15, %v939_v29  ;;  %v1210_v7 = vmul.f32 %v2815_v37, %v2952_v61  ;;  %v1310_v42 = vmul.f32 %v2829_v34, %v2958_v35 }
 0x187   : > { %v1311_v23 = vmul.f32 %v2829_v34, %v2960_v63  ;;  %2069 = vmatprep.subr.msk.bf16.mxu1 %vm364_vm2, %v1767_v25  ;;  %v1628_v51 = vadd.f32 %v1596_v1, %v1527_v22  ;;  %v1629_v27 = vadd.f32 %v1597_v62, %v1528_v28  ;;  %v1412_v47 = vmul.f32 %v2842_v44, %v3046_v3 }
 0x188   : > { %v1140_v40 = vadd.f32 %v1108_v59, %v1039_v52  ;;  %v1141_v8 = vadd.f32 %v1109_v18, %v1040_v6  ;;  %v1413_v38 = vmul.f32 %v2842_v44, %v3048_v26  ;;  %v1513_v48 = vmul.f32 %v2853_v55, %v3050_v11 }
 0x189   : > { %v1514_v56 = vmul.f32 %v2853_v55, %v3052_v2  ;;  %v1667_v49 = vadd.f32 %v2916_v12, %v1628_v51  ;;  %v1668_v1 = vadd.f32 %v2916_v12, %v1629_v27  ;;  %v1614_v57 = vmul.f32 %v2863_v53, %v3060_v54  ;;  %v3097_v27 = vld [vmem:[#allocation2 + $0x107] sm:$0xff] }
 0x18a   : > { %v1241_v62 = vadd.f32 %v1209_v36, %v1140_v40  ;;  %v1242_v5 = vadd.f32 %v1210_v7, %v1141_v8  ;;  %v1615_v15 = vmul.f32 %v2863_v53, %v3065_v30  ;;  %v789_v17 = vmul.f32 %v2728_v46, %v2888_v20 }
 0x18b   : > { %v790_v0 = vmul.f32 %v2728_v46, %v2892_v45  ;;  %v1699_v10 = vmax.f32 %v1667_v49, 0.0  ;;  %v1700_v31 = vmax.f32 %v1668_v1, 0.0  ;;  %v890_v59 = vmul.f32 %v2735_v58, %v2894_v14  ;;  %v3105_v49 = vld [vmem:[#allocation2 + $0x108] sm:$0xff]  ;;  %v3107_v1 = vld [vmem:[#allocation2 + $0x110] sm:$0xff] }
 0x18c   : > { %v1342_v29 = vadd.f32 %v1310_v42, %v1241_v62  ;;  %v1343_v18 = vadd.f32 %v1311_v23, %v1242_v5  ;;  %v891_v36 = vmul.f32 %v2735_v58, %v2900_v33  ;;  %v991_v25 = vmul.f32 %v2795_v39, %v2902_v4 }
 0x18d   : > { %v992_v22 = vmul.f32 %v2795_v39, %v2907_v60  ;;  %v1731_v20 = vmin.f32 %v1699_v10, 6.0  ;;  %v1732_v28 = vmin.f32 %v1700_v31, 6.0  ;;  %v922_v45 = vadd.f32 %v890_v59, %v789_v17  ;;  %v3099_v60 = vld [vmem:[#allocation2 + $0x10f] sm:$0xff] }
 0x18e   : > { %v1444_v52 = vadd.f32 %v1412_v47, %v1342_v29  ;;  %v1445_v6 = vadd.f32 %v1413_v38, %v1343_v18  ;;  %v923_v7 = vadd.f32 %v891_v36, %v790_v0  ;;  %v1092_v42 = vmul.f32 %v2804_v24, %v2995_v21  ;;  %v3112_v0 = vld [vmem:[#allocation2 + $0x109] sm:$0xff] }
 0x18f   : > { %v1093_v14 = vmul.f32 %v2804_v24, %v2999_v43  ;;  %v1759_v23 = vpack.c.bf16 %v1732_v28, %v1731_v20  ;;  %v1023_v51 = vadd.f32 %v991_v25, %v922_v45  ;;  %v1193_v4 = vmul.f32 %v2815_v37, %v3001_v19 }
 0x190   : > { %v1545_v33 = vadd.f32 %v1513_v48, %v1444_v52  ;;  %v1546_v40 = vadd.f32 %v1514_v56, %v1445_v6  ;;  %v1024_v47 = vadd.f32 %v992_v22, %v923_v7  ;;  %v1194_v8 = vmul.f32 %v2815_v37, %v3003_v13  ;;  %v3114_v56 = vld [vmem:[#allocation2 + $0x111] sm:$0xff] }
 0x191   : > { %v1294_v38 = vmul.f32 %v2829_v34, %v3010_v9  ;;  %v1795_v48 = vsel %vm364_vm2, %v1759_v23, 0  ;;  %v1124_v5 = vadd.f32 %v1092_v42, %v1023_v51  ;;  %v1295_v17 = vmul.f32 %v2829_v34, %v3014_v32 }
 0x192   : > { %v1646_v62 = vadd.f32 %v1614_v57, %v1545_v33  ;;  %2022 = vmatpush3.bf16.xpose.msra.mxu1 %v1795_v48  ;;  %v1647_v10 = vadd.f32 %v1615_v15, %v1546_v40  ;;  %v1125_v31 = vadd.f32 %v1093_v14, %v1024_v47  ;;  %v1396_v29 = vmul.f32 %v2842_v44, %v3097_v27 }
 0x193   : > { %v1397_v59 = vmul.f32 %v2842_v44, %v3099_v60  ;;  %v1225_v57 = vadd.f32 %v1193_v4, %v1124_v5  ;;  %v1497_v36 = vmul.f32 %v2853_v55, %v3105_v49  ;;  %v1498_v25 = vmul.f32 %v2853_v55, %v3107_v1 }
 0x194   : > { %v1685_v18 = vadd.f32 %v2916_v12, %v1646_v62  ;;  %v1686_v22 = vadd.f32 %v2916_v12, %v1647_v10  ;;  %v1226_v20 = vadd.f32 %v1194_v8, %v1125_v31  ;;  %v1598_v15 = vmul.f32 %v2863_v53, %v3112_v0  ;;  %v1377_v31 = vld [vmem:[#allocation2 + $0x227] sm:$0xff] }
 0x195   : > { %v1599_v28 = vmul.f32 %v2863_v53, %v3114_v56  ;;  %v1326_v45 = vadd.f32 %v1294_v38, %v1225_v57  ;;  %v807_v6 = vmul.f32 %v2728_v46, %v2944_v16  ;;  %v808_v7 = vmul.f32 %v2728_v46, %v2946_v41  ;;  %v1479_v57 = vld [vmem:[#allocation2 + $0x230] sm:$0xff] }
 0x196   : > { %v1717_v52 = vmax.f32 %v1685_v18, 0.0  ;;  %v1718_v42 = vmax.f32 %v1686_v22, 0.0  ;;  %v1327_v14 = vadd.f32 %v1295_v17, %v1226_v20  ;;  %v908_v23 = vmul.f32 %v2735_v58, %v2950_v50  ;;  %v1579_v22 = vld [vmem:[#allocation2 + $0x229] sm:$0xff] }
 0x197   : > { %v909_v33 = vmul.f32 %v2735_v58, %v2952_v61  ;;  %v1428_v4 = vadd.f32 %v1396_v29, %v1326_v45  ;;  %v1009_v40 = vmul.f32 %v2795_v39, %v2958_v35  ;;  %v1010_v47 = vmul.f32 %v2795_v39, %v2960_v63  ;;  %v1378_v63 = vld [vmem:[#allocation2 + $0x22f] sm:$0xff] }
 0x198   : > { %v1749_v51 = vmin.f32 %v1717_v52, 6.0  ;;  %v1750_v16 = vmin.f32 %v1718_v42, 6.0  ;;  %v1429_v8 = vadd.f32 %v1397_v59, %v1327_v14  ;;  %v940_v38 = vadd.f32 %v908_v23, %v807_v6  ;;  %v1478_v29 = vld [vmem:[#allocation2 + $0x228] sm:$0xff] }
 0x199   : > { %v941_v41 = vadd.f32 %v909_v33, %v808_v7  ;;  %v1529_v48 = vadd.f32 %v1497_v36, %v1428_v4  ;;  %v1110_v62 = vmul.f32 %v2804_v24, %v3046_v3  ;;  %v1111_v50 = vmul.f32 %v2804_v24, %v3048_v26  ;;  %v1580_v7 = vld [vmem:[#allocation2 + $0x231] sm:$0xff] }
 0x19a   : > { %v1211_v61 = vmul.f32 %v2815_v37, %v3050_v11  ;;  %v1768_v5 = vpack.c.bf16 %v1750_v16, %v1749_v51  ;;  %v1530_v17 = vadd.f32 %v1498_v25, %v1429_v8  ;;  %v1041_v35 = vadd.f32 %v1009_v40, %v940_v38 }
 0x19b   : > { %v1042_v10 = vadd.f32 %v1010_v47, %v941_v41  ;;  %v1630_v59 = vadd.f32 %v1598_v15, %v1529_v48  ;;  %v1212_v18 = vmul.f32 %v2815_v37, %v3052_v2  ;;  %v1312_v3 = vmul.f32 %v2829_v34, %v3060_v54 }
 0x19c   : > { %2070 = vmatprep.subr.msk.bf16.mxu1 %vm364_vm2, %v1768_v5  ;;  %v1631_v26 = vadd.f32 %v1599_v28, %v1530_v17  ;;  %v1142_v36 = vadd.f32 %v1110_v62, %v1041_v35  ;;  %v1313_v25 = vmul.f32 %v2829_v34, %v3065_v30  ;;  %v1414_v15 = vmul.f32 %v2842_v44, %v1377_v31 }
 0x19d   : > { %v1143_v11 = vadd.f32 %v1111_v50, %v1042_v10  ;;  %v1669_v20 = vadd.f32 %v2916_v12, %v1630_v59  ;;  %v1415_v52 = vmul.f32 %v2842_v44, %v1378_v63  ;;  %v1515_v2 = vmul.f32 %v2853_v55, %v1478_v29 }
 0x19e   : > { %v1670_v54 = vadd.f32 %v2916_v12, %v1631_v26  ;;  %v1243_v45 = vadd.f32 %v1211_v61, %v1142_v36  ;;  %v1516_v28 = vmul.f32 %v2853_v55, %v1479_v57  ;;  %v1616_v14 = vmul.f32 %v2863_v53, %v1579_v22  ;;  %v1462_v26 = vld [vmem:[#allocation2 + $0x128] sm:$0xff] }
 0x19f   : > { %v1244_v6 = vadd.f32 %v1212_v18, %v1143_v11  ;;  %v1701_v42 = vmax.f32 %v1669_v20, 0.0  ;;  %v791_v30 = vmul.f32 %v2728_v46, %v2995_v21  ;;  %v792_v23 = vmul.f32 %v2728_v46, %v2999_v43 }
 0x1a0   : > { %v1702_v33 = vmax.f32 %v1670_v54, 0.0  ;;  %v1344_v51 = vadd.f32 %v1312_v3, %v1243_v45  ;;  %v892_v40 = vmul.f32 %v2735_v58, %v3001_v19  ;;  %v1617_v16 = vmul.f32 %v2863_v53, %v1580_v7 }
 0x1a1   : > { %v1345_v4 = vadd.f32 %v1313_v25, %v1244_v6  ;;  %v1733_v47 = vmin.f32 %v1701_v42, 6.0  ;;  %v893_v8 = vmul.f32 %v2735_v58, %v3003_v13  ;;  %v993_v38 = vmul.f32 %v2795_v39, %v3010_v9  ;;  %v1463_v25 = vld [vmem:[#allocation2 + $0x130] sm:$0xff] }
 0x1a2   : > { %v1734_v41 = vmin.f32 %v1702_v33, 6.0  ;;  %v1446_v21 = vadd.f32 %v1414_v15, %v1344_v51  ;;  %v924_v62 = vadd.f32 %v892_v40, %v791_v30  ;;  %v994_v43 = vmul.f32 %v2795_v39, %v3014_v32  ;;  %v1563_v15 = vld [vmem:[#allocation2 + $0x129] sm:$0xff] }
 0x1a3   : > { %v1447_v48 = vadd.f32 %v1415_v52, %v1345_v4  ;;  %v925_v46 = vadd.f32 %v893_v8, %v792_v23  ;;  %v1094_v19 = vmul.f32 %v2804_v24, %v3097_v27  ;;  %v1095_v58 = vmul.f32 %v2804_v24, %v3099_v60  ;;  %v1361_v27 = vld [vmem:[#allocation2 + $0x127] sm:$0xff]  ;;  %v1362_v60 = vld [vmem:[#allocation2 + $0x12f] sm:$0xff] }
 0x1a4   : > { %v1760_v50 = vpack.c.bf16 %v1734_v41, %v1733_v47  ;;  %v1547_v61 = vadd.f32 %v1515_v2, %v1446_v21  ;;  %v1025_v17 = vadd.f32 %v993_v38, %v924_v62  ;;  %v1195_v13 = vmul.f32 %v2815_v37, %v3105_v49  ;;  %v1770_v49 = vld [vmem:[%s3224_s7] sm:$0xf] }
 0x1a5   : > { %v1548_v5 = vadd.f32 %v1516_v28, %v1447_v48  ;;  %v1026_v35 = vadd.f32 %v994_v43, %v925_v46  ;;  %v1196_v32 = vmul.f32 %v2815_v37, %v3107_v1  ;;  %v1296_v24 = vmul.f32 %v2829_v34, %v3112_v0  ;;  %v1872_v21 = vld [vmem:[%s320_s24] sm:$0xff] }
 0x1a6   : > { %v1798_v9 = vsel %vm364_vm2, %v1760_v50, 0  ;;  %v1648_v10 = vadd.f32 %v1616_v14, %v1547_v61  ;;  %v1126_v63 = vadd.f32 %v1094_v19, %v1025_v17  ;;  %v1297_v57 = vmul.f32 %v2829_v34, %v3114_v56  ;;  %v1564_v34 = vld [vmem:[#allocation2 + $0x131] sm:$0xff] }
 0x1a7   : > { %v1649_v31 = vadd.f32 %v1617_v16, %v1548_v5  ;;  %2024 = vmatpush3.bf16.xpose.msra.mxu1 %v1798_v9  ;;  %v1127_v39 = vadd.f32 %v1095_v58, %v1026_v35  ;;  %v1398_v11 = vmul.f32 %v2842_v44, %v1361_v27  ;;  %v2104_v22 = vmov 0  }
 0x1a8   : > { %v1687_v29 = vadd.f32 %v2916_v12, %v1648_v10  ;;  %v1227_v18 = vadd.f32 %v1195_v13, %v1126_v63  ;;  %2082 = vset.pattern.permute.xlu0 %v2104_v22  ;;  %v1399_v0 = vmul.f32 %v2842_v44, %v1362_v60  ;;  %v1499_v45 = vmul.f32 %v2853_v55, %v1462_v26 }
 0x1a9   : > { %v1688_v59 = vadd.f32 %v2916_v12, %v1649_v31  ;;  %v1228_v3 = vadd.f32 %v1196_v32, %v1127_v39  ;;  %1773 = vperm.xlu0 %2082, %v1770_v49   ;;  %v1500_v6 = vmul.f32 %v2853_v55, %v1463_v25  ;;  %v1600_v42 = vmul.f32 %v2863_v53, %v1563_v15 }
 0x1aa   : > { %v1719_v37 = vmax.f32 %v1687_v29, 0.0  ;;  %v1328_v36 = vadd.f32 %v1296_v24, %v1227_v18  ;;  %v1601_v30 = vmul.f32 %v2863_v53, %v1564_v34  ;;  %v2094_v53 = vld [vmem:[%s3223_s6] sm:$0x3]  ;;  %v1874_v61 = vcombine.high %v1872_v21, %v1872_v21 }
 0x1ab   : > { %v1720_v1 = vmax.f32 %v1688_v59, 0.0  ;;  %v1329_v20 = vadd.f32 %v1297_v57, %v1228_v3 }
 0x1ac   : > { %v1751_v52 = vmin.f32 %v1719_v37, 6.0  ;;  %v1430_v54 = vadd.f32 %v1398_v11, %v1328_v36 }
 0x1ad   : > { %v1752_v2 = vmin.f32 %v1720_v1, 6.0  ;;  %v1431_v56 = vadd.f32 %v1399_v0, %v1329_v20 }
 0x1ae   : > { %v1531_v7 = vadd.f32 %v1499_v45, %v1430_v54 }
 0x1af   : > { %v1769_v28 = vpack.c.bf16 %v1752_v2, %v1751_v52  ;;  %v1532_v14 = vadd.f32 %v1500_v6, %v1431_v56 }
 0x1b0   : > { %v1632_v44 = vadd.f32 %v1600_v42, %v1531_v7 }
 0x1b1   : > { %2071 = vmatprep.subr.msk.bf16.mxu1 %vm364_vm2, %v1769_v28  ;;  %v1633_v23 = vadd.f32 %v1601_v30, %v1532_v14 }
 0x1b2   : > { %v1671_v33 = vadd.f32 %v2916_v12, %v1632_v44 }
 0x1b3   : > { %v1672_v51 = vadd.f32 %v2916_v12, %v1633_v23 }
 0x1b4   : > { %v1703_v4 = vmax.f32 %v1671_v33, 0.0 }
 0x1b5   : > { %v1704_v40 = vmax.f32 %v1672_v51, 0.0 }
 0x1b6   : > { %v1735_v47 = vmin.f32 %v1703_v4, 6.0 }
 0x1b7   : > { %v1736_v55 = vmin.f32 %v1704_v40, 6.0 }
 0x1b9   : > { %v1761_v16 = vpack.c.bf16 %v1736_v55, %v1735_v47 }
 0x1bb   : > { %v1801_v8 = vsel %vm364_vm2, %v1761_v16, 0 }
 0x1bc   : > { %2026 = vmatpush3.bf16.xpose.msra.mxu1 %v1801_v8 }
 0x1c3   : > { %2028 = vmatmul.mubr.msk.bf16.vlgmr.msra.gmra.mrb[0].mxu1 %vm364_vm2, %v2094_v53 }
 0x228   : > { %v1774_v38 = vpop.permute.xlu0 %1773 }
 0x296   : > { %v1861_v12 = vpop.f32.mrb[0].mxu1 }
 0x297   : > { %v1862_v41 = vadd.f32 %v1861_v12, %v1774_v38  ;;  %v1863_v48 = vpop.f32.mrb[1].mxu1 }
 0x298   : > { %v1864_v62 = vadd.f32 %v1863_v48, %v1774_v38  ;;  %v1865_v46 = vpop.f32.mrb[2].mxu1 }
 0x299   : > { %v1868_v43 = vmax.f32 %v1862_v41, 0.0  ;;  %v1866_v19 = vpop.f32.mrb[3].mxu1 }
 0x29a   : > { %v1869_v50 = vmax.f32 %v1864_v62, 0.0 }
 0x29b   : > { %v1870_v5 = vmin.f32 %v1868_v43, 6.0 }
 0x29c   : > { %v1871_v17 = vmin.f32 %v1869_v50, 6.0 }
 0x29d   : > { %v1876_v35 = vadd.f32 %v1872_v21, %v1870_v5 }
 0x29e   : > { %v1877_v58 = vadd.f32 %v1874_v61, %v1871_v17 }
 0x2a0   : > { %v1880_v13 = vcombine.low %v1876_v35, %v1877_v58 }
 0x2a2   : > { %1882 = vst [vmem:[%s325_s26] sm:$0xff] %v1880_v13 }
 0x2a3 PF: > { %s18_s27 = sadd.s32 1, %s2101_s27  }
 0x2a4   : > { %p15_p4 = scmp.ge.s32.totalorder %s18_s27, 4  }
 0x2a6   :  { %17 = sbr.rel (!%p15_p4) target bundleno = 1 (0x1), region = 88 }

</bundles_post_ra>
